<compile_context>
chip_gen: v5e
topology: v5e:2x2
jax: 0.10.0
libtpu: 0.0.40
codegen_flags: <defaults>
</compile_context>

<pallas_src>
import math
from functools import partial

import jax
import jax.numpy as jnp
from jax.experimental import pallas as pl
from jax.experimental.pallas import tpu as pltpu


# ----------------------------- kernel helpers ------------------------------

def _layernorm(v, g, b, eps=1e-5):
    mu = jnp.mean(v, axis=-1, keepdims=True)
    var = jnp.mean((v - mu) ** 2, axis=-1, keepdims=True)
    return (v - mu) * jax.lax.rsqrt(var + eps) * g + b


def _gelu_exact(v):
    # nn.GELU default = exact (erf) GELU
    return 0.5 * v * (1.0 + jax.lax.erf(v * (1.0 / math.sqrt(2.0))))


# --------------------------------- kernel ----------------------------------

def block_kernel(x_ref, wqkv_ref, wproj_ref, bproj_ref,
                 ln1g_ref, ln1b_ref, ln2g_ref, ln2b_ref,
                 wfc1_ref, bfc1_ref, wfc2_ref, bfc2_ref,
                 out_ref, wts_ref, *, num_heads, batch, seq):
    x = x_ref[...]                               # (batch*seq, C)  all rows at once
    C = x.shape[-1]
    d = C // num_heads
    scale = d ** (-0.5)

    # ---- attention branch: norm1 -> qkv -> masked softmax -> (fused) proj ----
    h1 = _layernorm(x, ln1g_ref[...], ln1b_ref[...])
    qkv = jnp.dot(h1, wqkv_ref[...], preferred_element_type=jnp.float32)   # (B*N, 3C)
    qkv3 = qkv.reshape(batch, seq, 3 * C)        # leading-dim split only (layout no-op)

    # cls-token mask (batch / head invariant) — built once per grid step:
    #   row 0: cols 1,2 zeroed ; row 1: cols 0,2 zeroed ; row 2: cols 0,1 zeroed
    r = jax.lax.broadcasted_iota(jnp.int32, (seq, seq), 0)
    c = jax.lax.broadcasted_iota(jnp.int32, (seq, seq), 1)
    masked = (((r == 0) & ((c == 1) | (c == 2)))
              | ((r == 1) & ((c == 0) | (c == 2)))
              | ((r == 2) & ((c == 0) | (c == 1))))
    mask = jnp.where(masked, 0.0, 1.0).astype(jnp.float32)[None]          # (1, N, N)

    # accumulate proj output directly (no lane concat of head outputs)
    o_acc = jnp.zeros((batch * seq, C), jnp.float32)

    for hh in range(num_heads):                  # static loop; small H
        qh = qkv3[:, :, hh * d:(hh + 1) * d]                   # (B, N, d)
        kh = qkv3[:, :, C + hh * d:C + (hh + 1) * d]           # (B, N, d)
        vh = qkv3[:, :, 2 * C + hh * d:2 * C + (hh + 1) * d]   # (B, N, d)

        logits = jnp.einsum('bqd,bkd->bqk', qh, kh,
                            preferred_element_type=jnp.float32) * scale    # (B, N, N)
        logits = logits * mask                   # multiplicative mask (as in torch)
        m = jnp.max(logits, axis=-1, keepdims=True)
        e = jnp.exp(logits - m)
        attn = e * pl.reciprocal(jnp.sum(e, axis=-1, keepdims=True))       # exact

        # lane-packed weights slab: wts[b, q, h*N + k] = attn[b, h, q, k]
        wts_ref[:, :, hh * seq:(hh + 1) * seq] = attn

        av = jnp.einsum('bqk,bkd->bqd', attn, vh,
                        preferred_element_type=jnp.float32)                # (B, N, d)
        # fuse head-concat into the projection: row-slice of w_proj (cheap sublane slice)
        o_acc = o_acc + jnp.dot(av.reshape(batch * seq, d),
                                wproj_ref[hh * d:(hh + 1) * d, :],
                                preferred_element_type=jnp.float32)

    x1 = x + o_acc + bproj_ref[...]              # residual 1 (drop_path = identity)

    # ---- MLP branch: norm2 -> fc1 -> GELU -> fc2 ----
    h2 = _layernorm(x1, ln2g_ref[...], ln2b_ref[...])
    f = jnp.dot(h2, wfc1_ref[...], preferred_element_type=jnp.float32) + bfc1_ref[...]
    f = _gelu_exact(f)
    f = jnp.dot(f, wfc2_ref[...], preferred_element_type=jnp.float32) + bfc2_ref[...]

    out_ref[...] = (x1 + f).astype(out_ref.dtype)               # residual 2


# -------------------------------- wrapper -----------------------------------

def block_forward(x, params, num_heads):
    B, N, C = x.shape
    Hm = params["w_fc1"].shape[1]
    rows = B * N

    x2d = x.reshape(rows, C)                     # fold batch into the row dim

    def full2d(shape):
        return pl.BlockSpec(shape, lambda i: (0, 0))

    kernel = partial(block_kernel, num_heads=num_heads, batch=B, seq=N)

    out2d, wts3 = pl.pallas_call(
        kernel,
        out_shape=(jax.ShapeDtypeStruct((rows, C), x.dtype),
                   jax.ShapeDtypeStruct((B, N, num_heads * N), jnp.float32)),
        grid_spec=pltpu.PrefetchScalarGridSpec(
            num_scalar_prefetch=0,
            grid=(1,),                                            # batch folded: 1 step
            in_specs=[
                pl.BlockSpec((rows, C), lambda i: (i, 0)),        # x rows
                full2d((C, 3 * C)),                               # w_qkv  (in, out)
                full2d((C, C)),                                   # w_proj (in, out)
                full2d((1, C)),                                   # b_proj
                full2d((1, C)), full2d((1, C)),                   # ln1 gamma/beta
                full2d((1, C)), full2d((1, C)),                   # ln2 gamma/beta
                full2d((C, Hm)), full2d((1, Hm)),                 # fc1 w/b
                full2d((Hm, C)), full2d((1, C)),                  # fc2 w/b
            ],
            out_specs=[
                pl.BlockSpec((rows, C), lambda i: (i, 0)),
                pl.BlockSpec((B, N, num_heads * N), lambda i: (i, 0, 0)),
            ],
        ),
        # batch blocks are independent -> "parallel" (no-op on 1-TC chips)
        compiler_params=pltpu.CompilerParams(dimension_semantics=("parallel",)),
    )(x2d, params["w_qkv"], params["w_proj"], params["b_proj"],
      params["ln1_g"], params["ln1_b"], params["ln2_g"], params["ln2_b"],
      params["w_fc1"], params["b_fc1"], params["w_fc2"], params["b_fc2"])

    out = out2d.reshape(B, N, C)
    weights = wts3.reshape(B, N, num_heads, N).transpose(0, 2, 1, 3)  # (B, H, N, N)
    return out, weights


# ---------------------------- pure-JAX reference -----------------------------

def block_reference(x, params, num_heads):
    def ln(v, g, b):
        mu = v.mean(-1, keepdims=True)
        var = ((v - mu) ** 2).mean(-1, keepdims=True)
        return (v - mu) / jnp.sqrt(var + 1e-5) * g + b

    B, N, C = x.shape
    d = C // num_heads
    h = ln(x, params["ln1_g"][0], params["ln1_b"][0])
    qkv = (h @ params["w_qkv"]).reshape(B, N, 3, num_heads, d).transpose(2, 0, 3, 1, 4)
    q, k, v = qkv[0], qkv[1], qkv[2]
    attn = jnp.einsum("bhqd,bhkd->bhqk", q, k) * d ** (-0.5)
    r = jnp.arange(N)[:, None]
    c = jnp.arange(N)[None, :]
    masked = (((r == 0) & ((c == 1) | (c == 2)))
              | ((r == 1) & ((c == 0) | (c == 2)))
              | ((r == 2) & ((c == 0) | (c == 1))))
    attn = attn * jnp.where(masked, 0.0, 1.0)
    attn = jax.nn.softmax(attn, axis=-1)
    o = jnp.einsum("bhqk,bhkd->bhqd", attn, v).transpose(0, 2, 1, 3).reshape(B, N, C)
    o = o @ params["w_proj"] + params["b_proj"][0]
    x1 = x + o
    h2 = ln(x1, params["ln2_g"][0], params["ln2_b"][0])
    f = jax.nn.gelu(h2 @ params["w_fc1"] + params["b_fc1"][0], approximate=False)
    f = f @ params["w_fc2"] + params["b_fc2"][0]
    return x1 + f, attn


# ----------------------------------- main ------------------------------------

if __name__ == "__main__":
    B, N, C = 2, 8, 32
    num_heads = 4
    mlp_ratio = 4.0
    Hm = int(C * mlp_ratio)

    key = jax.random.PRNGKey(0)
    ks = jax.random.split(key, 8)

    # Deterministic synthetic parameters (Linear weights stored as (in, out)).
    params = {
        "w_qkv": 0.05 * jax.random.normal(ks[0], (C, 3 * C), jnp.float32),
        "w_proj": 0.05 * jax.random.normal(ks[1], (C, C), jnp.float32),
        "b_proj": 0.01 * jax.random.normal(ks[2], (1, C), jnp.float32),
        "ln1_g": jnp.ones((1, C), jnp.float32),
        "ln1_b": jnp.zeros((1, C), jnp.float32),
        "ln2_g": jnp.ones((1, C), jnp.float32),
        "ln2_b": jnp.zeros((1, C), jnp.float32),
        "w_fc1": 0.05 * jax.random.normal(ks[3], (C, Hm), jnp.float32),
        "b_fc1": 0.01 * jax.random.normal(ks[4], (1, Hm), jnp.float32),
        "w_fc2": 0.05 * jax.random.normal(ks[5], (Hm, C), jnp.float32),
        "b_fc2": 0.01 * jax.random.normal(ks[6], (1, C), jnp.float32),
    }
    x = jax.random.normal(ks[7], (B, N, C), jnp.float32)

    out, weights = block_forward(x, params, num_heads)
    out, weights = jax.block_until_ready((out, weights))

    ref_out, ref_w = block_reference(x, params, num_heads)
    assert out.shape == (B, N, C) and weights.shape == (B, num_heads, N, N)
    assert jnp.allclose(out, ref_out, rtol=2e-4, atol=2e-4), "output mismatch"
    assert jnp.allclose(weights, ref_w, rtol=2e-4, atol=2e-4), "attn weights mismatch"

    print("KERNEL_OK")
</pallas_src>

<mosaic_0001>
module attributes {stable_mosaic.version = 11 : i64} {
  func.func @block_kernel(%arg0: i32, %arg1: memref<16x32xf32, #tpu.memory_space<vmem>>, %arg2: memref<32x96xf32, #tpu.memory_space<vmem>>, %arg3: memref<32x32xf32, #tpu.memory_space<vmem>>, %arg4: memref<1x32xf32, #tpu.memory_space<vmem>>, %arg5: memref<1x32xf32, #tpu.memory_space<vmem>>, %arg6: memref<1x32xf32, #tpu.memory_space<vmem>>, %arg7: memref<1x32xf32, #tpu.memory_space<vmem>>, %arg8: memref<1x32xf32, #tpu.memory_space<vmem>>, %arg9: memref<32x128xf32, #tpu.memory_space<vmem>>, %arg10: memref<1x128xf32, #tpu.memory_space<vmem>>, %arg11: memref<128x32xf32, #tpu.memory_space<vmem>>, %arg12: memref<1x32xf32, #tpu.memory_space<vmem>>, %arg13: memref<16x32xf32, #tpu.memory_space<vmem>>, %arg14: memref<2x8x32xf32, #tpu.memory_space<vmem>>) attributes {dimension_semantics = [#tpu.dimension_semantics<parallel>], iteration_bounds = array<i64: 1>, scalar_prefetch = 0 : i64, scratch_operands = 0 : i64, tpu.core_type = #tpu.core_type<tc>, window_params = [{transform_indices = @transform_0, window_bounds = array<i64: 16, 32>}, {pipeline_mode = #tpu.pipeline_mode<synchronous>, transform_indices = @transform_1, window_bounds = array<i64: 32, 96>}, {pipeline_mode = #tpu.pipeline_mode<synchronous>, transform_indices = @transform_2, window_bounds = array<i64: 32, 32>}, {pipeline_mode = #tpu.pipeline_mode<synchronous>, transform_indices = @transform_3, window_bounds = array<i64: 1, 32>}, {pipeline_mode = #tpu.pipeline_mode<synchronous>, transform_indices = @transform_4, window_bounds = array<i64: 1, 32>}, {pipeline_mode = #tpu.pipeline_mode<synchronous>, transform_indices = @transform_5, window_bounds = array<i64: 1, 32>}, {pipeline_mode = #tpu.pipeline_mode<synchronous>, transform_indices = @transform_6, window_bounds = array<i64: 1, 32>}, {pipeline_mode = #tpu.pipeline_mode<synchronous>, transform_indices = @transform_7, window_bounds = array<i64: 1, 32>}, {pipeline_mode = #tpu.pipeline_mode<synchronous>, transform_indices = @transform_8, window_bounds = array<i64: 32, 128>}, {pipeline_mode = #tpu.pipeline_mode<synchronous>, transform_indices = @transform_9, window_bounds = array<i64: 1, 128>}, {pipeline_mode = #tpu.pipeline_mode<synchronous>, transform_indices = @transform_10, window_bounds = array<i64: 128, 32>}, {pipeline_mode = #tpu.pipeline_mode<synchronous>, transform_indices = @transform_11, window_bounds = array<i64: 1, 32>}, {transform_indices = @transform_12, window_bounds = array<i64: 16, 32>}, {transform_indices = @transform_13, window_bounds = array<i64: 2, 8, 32>}]} {
    %c0 = arith.constant 0 : index
    %c0_0 = arith.constant 0 : index
    %0 = vector.load %arg1[%c0, %c0_0] : memref<16x32xf32, #tpu.memory_space<vmem>>, vector<16x32xf32>
    %c0_1 = arith.constant 0 : index
    %c0_2 = arith.constant 0 : index
    %1 = vector.load %arg5[%c0_1, %c0_2] : memref<1x32xf32, #tpu.memory_space<vmem>>, vector<1x32xf32>
    %c0_3 = arith.constant 0 : index
    %c0_4 = arith.constant 0 : index
    %2 = vector.load %arg6[%c0_3, %c0_4] : memref<1x32xf32, #tpu.memory_space<vmem>>, vector<1x32xf32>
    %cst = arith.constant dense<0.000000e+00> : vector<16xf32>
    %3 = vector.multi_reduction <add>, %0, %cst [1] : vector<16x32xf32> to vector<16xf32>
    %4 = vector.shape_cast %3 : vector<16xf32> to vector<16x1xf32>
    %cst_5 = arith.constant 3.200000e+01 : f32
    %5 = vector.broadcast %cst_5 : f32 to vector<16x1xf32>
    %6 = arith.divf %4, %5 : vector<16x1xf32>
    %7 = vector.broadcast %6 : vector<16x1xf32> to vector<16x32xf32>
    %8 = arith.subf %0, %7 : vector<16x32xf32>
    %9 = arith.mulf %8, %8 : vector<16x32xf32>
    %cst_6 = arith.constant dense<0.000000e+00> : vector<16xf32>
    %10 = vector.multi_reduction <add>, %9, %cst_6 [1] : vector<16x32xf32> to vector<16xf32>
    %11 = vector.shape_cast %10 : vector<16xf32> to vector<16x1xf32>
    %cst_7 = arith.constant 3.200000e+01 : f32
    %12 = vector.broadcast %cst_7 : f32 to vector<16x1xf32>
    %13 = arith.divf %11, %12 : vector<16x1xf32>
    %14 = vector.broadcast %6 : vector<16x1xf32> to vector<16x32xf32>
    %15 = arith.subf %0, %14 : vector<16x32xf32>
    %cst_8 = arith.constant 9.99999974E-6 : f32
    %16 = vector.broadcast %cst_8 : f32 to vector<16x1xf32>
    %17 = arith.addf %13, %16 : vector<16x1xf32>
    %18 = math.rsqrt %17 : vector<16x1xf32>
    %19 = vector.broadcast %18 : vector<16x1xf32> to vector<16x32xf32>
    %20 = arith.mulf %15, %19 : vector<16x32xf32>
    %21 = vector.broadcast %1 : vector<1x32xf32> to vector<16x32xf32>
    %22 = arith.mulf %20, %21 : vector<16x32xf32>
    %23 = vector.broadcast %2 : vector<1x32xf32> to vector<16x32xf32>
    %24 = arith.addf %22, %23 : vector<16x32xf32>
    %c0_9 = arith.constant 0 : index
    %c0_10 = arith.constant 0 : index
    %25 = vector.load %arg2[%c0_9, %c0_10] : memref<32x96xf32, #tpu.memory_space<vmem>>, vector<32x96xf32>
    %cst_11 = arith.constant dense<0.000000e+00> : vector<16x96xf32>
    %26 = tpu.matmul %24, %25, %cst_11 {dimension_numbers = #tpu.dot_dimension_numbers<[1], [0], [0], [1], [0, 0, 1, 1], [], []>} : vector<16x32xf32>, vector<32x96xf32>, vector<16x96xf32> -> vector<16x96xf32>
    %27 = vector.shape_cast %26 : vector<16x96xf32> to vector<2x8x96xf32>
    %28 = tpu.iota {dimensions = array<i32: 0>} : vector<8x8xi32>
    %29 = tpu.iota {dimensions = array<i32: 1>} : vector<8x8xi32>
    %c0_i32 = arith.constant 0 : i32
    %30 = vector.broadcast %c0_i32 : i32 to vector<8x8xi32>
    %31 = arith.cmpi eq, %28, %30 : vector<8x8xi32>
    %c1_i32 = arith.constant 1 : i32
    %32 = vector.broadcast %c1_i32 : i32 to vector<8x8xi32>
    %33 = arith.cmpi eq, %29, %32 : vector<8x8xi32>
    %c2_i32 = arith.constant 2 : i32
    %34 = vector.broadcast %c2_i32 : i32 to vector<8x8xi32>
    %35 = arith.cmpi eq, %29, %34 : vector<8x8xi32>
    %36 = arith.ori %33, %35 : vector<8x8xi1>
    %37 = arith.andi %31, %36 : vector<8x8xi1>
    %c1_i32_12 = arith.constant 1 : i32
    %38 = vector.broadcast %c1_i32_12 : i32 to vector<8x8xi32>
    %39 = arith.cmpi eq, %28, %38 : vector<8x8xi32>
    %c0_i32_13 = arith.constant 0 : i32
    %40 = vector.broadcast %c0_i32_13 : i32 to vector<8x8xi32>
    %41 = arith.cmpi eq, %29, %40 : vector<8x8xi32>
    %c2_i32_14 = arith.constant 2 : i32
    %42 = vector.broadcast %c2_i32_14 : i32 to vector<8x8xi32>
    %43 = arith.cmpi eq, %29, %42 : vector<8x8xi32>
    %44 = arith.ori %41, %43 : vector<8x8xi1>
    %45 = arith.andi %39, %44 : vector<8x8xi1>
    %46 = arith.ori %37, %45 : vector<8x8xi1>
    %c2_i32_15 = arith.constant 2 : i32
    %47 = vector.broadcast %c2_i32_15 : i32 to vector<8x8xi32>
    %48 = arith.cmpi eq, %28, %47 : vector<8x8xi32>
    %c0_i32_16 = arith.constant 0 : i32
    %49 = vector.broadcast %c0_i32_16 : i32 to vector<8x8xi32>
    %50 = arith.cmpi eq, %29, %49 : vector<8x8xi32>
    %c1_i32_17 = arith.constant 1 : i32
    %51 = vector.broadcast %c1_i32_17 : i32 to vector<8x8xi32>
    %52 = arith.cmpi eq, %29, %51 : vector<8x8xi32>
    %53 = arith.ori %50, %52 : vector<8x8xi1>
    %54 = arith.andi %48, %53 : vector<8x8xi1>
    %55 = arith.ori %46, %54 : vector<8x8xi1>
    %cst_18 = arith.constant 0.000000e+00 : f32
    %cst_19 = arith.constant 1.000000e+00 : f32
    %56 = vector.broadcast %cst_18 : f32 to vector<8x8xf32>
    %57 = vector.broadcast %cst_19 : f32 to vector<8x8xf32>
    %58 = arith.select %55, %56, %57 : vector<8x8xi1>, vector<8x8xf32>
    %59 = vector.shape_cast %58 : vector<8x8xf32> to vector<1x8x8xf32>
    %cst_20 = arith.constant 0.000000e+00 : f32
    %60 = vector.broadcast %cst_20 : f32 to vector<16x32xf32>
    %61 = vector.extract_strided_slice %27 {offsets = [0, 0, 0], sizes = [2, 8, 8], strides = [1, 1, 1]} : vector<2x8x96xf32> to vector<2x8x8xf32>
    %62 = vector.extract_strided_slice %27 {offsets = [0, 0, 32], sizes = [2, 8, 8], strides = [1, 1, 1]} : vector<2x8x96xf32> to vector<2x8x8xf32>
    %63 = vector.extract_strided_slice %27 {offsets = [0, 0, 64], sizes = [2, 8, 8], strides = [1, 1, 1]} : vector<2x8x96xf32> to vector<2x8x8xf32>
    "tpu.trace_start"() <{level = 10 : i32, message = "bqd,bkd->bqk"}> : () -> ()
    %cst_21 = arith.constant dense<0.000000e+00> : vector<2x8x8xf32>
    %64 = tpu.matmul %61, %62, %cst_21 {dimension_numbers = #tpu.dot_dimension_numbers<[2], [2], [1], [1], [0, 0, 0, 1, 1, 1], [0], [0]>} : vector<2x8x8xf32>, vector<2x8x8xf32>, vector<2x8x8xf32> -> vector<2x8x8xf32>
    "tpu.trace_stop"() : () -> ()
    %cst_22 = arith.constant 0.353553385 : f32
    %65 = vector.broadcast %cst_22 : f32 to vector<2x8x8xf32>
    %66 = arith.mulf %64, %65 : vector<2x8x8xf32>
    %67 = vector.broadcast %59 : vector<1x8x8xf32> to vector<2x8x8xf32>
    %68 = arith.mulf %66, %67 : vector<2x8x8xf32>
    %cst_23 = arith.constant dense<0xFF800000> : vector<2x8xf32>
    %69 = vector.multi_reduction <maximumf>, %68, %cst_23 [2] : vector<2x8x8xf32> to vector<2x8xf32>
    %70 = vector.shape_cast %69 : vector<2x8xf32> to vector<2x8x1xf32>
    %71 = vector.broadcast %70 : vector<2x8x1xf32> to vector<2x8x8xf32>
    %72 = arith.subf %68, %71 : vector<2x8x8xf32>
    %73 = math.exp %72 : vector<2x8x8xf32>
    %cst_24 = arith.constant dense<0.000000e+00> : vector<2x8xf32>
    %74 = vector.multi_reduction <add>, %73, %cst_24 [2] : vector<2x8x8xf32> to vector<2x8xf32>
    %75 = vector.shape_cast %74 : vector<2x8xf32> to vector<2x8x1xf32>
    %76 = tpu.reciprocal %75 : vector<2x8x1xf32> -> vector<2x8x1xf32>
    %77 = vector.broadcast %76 : vector<2x8x1xf32> to vector<2x8x8xf32>
    %78 = arith.mulf %73, %77 : vector<2x8x8xf32>
    %c0_25 = arith.constant 0 : index
    %c0_26 = arith.constant 0 : index
    %c0_27 = arith.constant 0 : index
    %79 = vector.load %arg14[%c0_25, %c0_26, %c0_27] : memref<2x8x32xf32, #tpu.memory_space<vmem>>, vector<2x8x8xf32>
    tpu.vector_store %arg14[%c0_25, %c0_26, %c0_27], %78 {strides = array<i32>} : memref<2x8x32xf32, #tpu.memory_space<vmem>>, vector<2x8x8xf32>,
    "tpu.trace_start"() <{level = 10 : i32, message = "bqk,bkd->bqd"}> : () -> ()
    %cst_28 = arith.constant dense<0.000000e+00> : vector<2x8x8xf32>
    %80 = tpu.matmul %78, %63, %cst_28 {dimension_numbers = #tpu.dot_dimension_numbers<[2], [1], [1], [2], [0, 0, 0, 1, 1, 2], [0], [0]>} : vector<2x8x8xf32>, vector<2x8x8xf32>, vector<2x8x8xf32> -> vector<2x8x8xf32>
    "tpu.trace_stop"() : () -> ()
    %81 = vector.shape_cast %80 : vector<2x8x8xf32> to vector<16x8xf32>
    %c0_29 = arith.constant 0 : index
    %c0_30 = arith.constant 0 : index
    %82 = vector.load %arg3[%c0_29, %c0_30] : memref<32x32xf32, #tpu.memory_space<vmem>>, vector<8x32xf32>
    %cst_31 = arith.constant dense<0.000000e+00> : vector<16x32xf32>
    %83 = tpu.matmul %81, %82, %cst_31 {dimension_numbers = #tpu.dot_dimension_numbers<[1], [0], [0], [1], [0, 0, 1, 1], [], []>} : vector<16x8xf32>, vector<8x32xf32>, vector<16x32xf32> -> vector<16x32xf32>
    %84 = arith.addf %60, %83 : vector<16x32xf32>
    %85 = vector.extract_strided_slice %27 {offsets = [0, 0, 8], sizes = [2, 8, 8], strides = [1, 1, 1]} : vector<2x8x96xf32> to vector<2x8x8xf32>
    %86 = vector.extract_strided_slice %27 {offsets = [0, 0, 40], sizes = [2, 8, 8], strides = [1, 1, 1]} : vector<2x8x96xf32> to vector<2x8x8xf32>
    %87 = vector.extract_strided_slice %27 {offsets = [0, 0, 72], sizes = [2, 8, 8], strides = [1, 1, 1]} : vector<2x8x96xf32> to vector<2x8x8xf32>
    "tpu.trace_start"() <{level = 10 : i32, message = "bqd,bkd->bqk"}> : () -> ()
    %cst_32 = arith.constant dense<0.000000e+00> : vector<2x8x8xf32>
    %88 = tpu.matmul %85, %86, %cst_32 {dimension_numbers = #tpu.dot_dimension_numbers<[2], [2], [1], [1], [0, 0, 0, 1, 1, 1], [0], [0]>} : vector<2x8x8xf32>, vector<2x8x8xf32>, vector<2x8x8xf32> -> vector<2x8x8xf32>
    "tpu.trace_stop"() : () -> ()
    %cst_33 = arith.constant 0.353553385 : f32
    %89 = vector.broadcast %cst_33 : f32 to vector<2x8x8xf32>
    %90 = arith.mulf %88, %89 : vector<2x8x8xf32>
    %91 = vector.broadcast %59 : vector<1x8x8xf32> to vector<2x8x8xf32>
    %92 = arith.mulf %90, %91 : vector<2x8x8xf32>
    %cst_34 = arith.constant dense<0xFF800000> : vector<2x8xf32>
    %93 = vector.multi_reduction <maximumf>, %92, %cst_34 [2] : vector<2x8x8xf32> to vector<2x8xf32>
    %94 = vector.shape_cast %93 : vector<2x8xf32> to vector<2x8x1xf32>
    %95 = vector.broadcast %94 : vector<2x8x1xf32> to vector<2x8x8xf32>
    %96 = arith.subf %92, %95 : vector<2x8x8xf32>
    %97 = math.exp %96 : vector<2x8x8xf32>
    %cst_35 = arith.constant dense<0.000000e+00> : vector<2x8xf32>
    %98 = vector.multi_reduction <add>, %97, %cst_35 [2] : vector<2x8x8xf32> to vector<2x8xf32>
    %99 = vector.shape_cast %98 : vector<2x8xf32> to vector<2x8x1xf32>
    %100 = tpu.reciprocal %99 : vector<2x8x1xf32> -> vector<2x8x1xf32>
    %101 = vector.broadcast %100 : vector<2x8x1xf32> to vector<2x8x8xf32>
    %102 = arith.mulf %97, %101 : vector<2x8x8xf32>
    %c0_36 = arith.constant 0 : index
    %c0_37 = arith.constant 0 : index
    %c8 = arith.constant 8 : index
    %103 = vector.load %arg14[%c0_36, %c0_37, %c8] : memref<2x8x32xf32, #tpu.memory_space<vmem>>, vector<2x8x8xf32>
    tpu.vector_store %arg14[%c0_36, %c0_37, %c8], %102 {strides = array<i32>} : memref<2x8x32xf32, #tpu.memory_space<vmem>>, vector<2x8x8xf32>,
    "tpu.trace_start"() <{level = 10 : i32, message = "bqk,bkd->bqd"}> : () -> ()
    %cst_38 = arith.constant dense<0.000000e+00> : vector<2x8x8xf32>
    %104 = tpu.matmul %102, %87, %cst_38 {dimension_numbers = #tpu.dot_dimension_numbers<[2], [1], [1], [2], [0, 0, 0, 1, 1, 2], [0], [0]>} : vector<2x8x8xf32>, vector<2x8x8xf32>, vector<2x8x8xf32> -> vector<2x8x8xf32>
    "tpu.trace_stop"() : () -> ()
    %105 = vector.shape_cast %104 : vector<2x8x8xf32> to vector<16x8xf32>
    %c8_39 = arith.constant 8 : index
    %c0_40 = arith.constant 0 : index
    %106 = vector.load %arg3[%c8_39, %c0_40] : memref<32x32xf32, #tpu.memory_space<vmem>>, vector<8x32xf32>
    %cst_41 = arith.constant dense<0.000000e+00> : vector<16x32xf32>
    %107 = tpu.matmul %105, %106, %cst_41 {dimension_numbers = #tpu.dot_dimension_numbers<[1], [0], [0], [1], [0, 0, 1, 1], [], []>} : vector<16x8xf32>, vector<8x32xf32>, vector<16x32xf32> -> vector<16x32xf32>
    %108 = arith.addf %84, %107 : vector<16x32xf32>
    %109 = vector.extract_strided_slice %27 {offsets = [0, 0, 16], sizes = [2, 8, 8], strides = [1, 1, 1]} : vector<2x8x96xf32> to vector<2x8x8xf32>
    %110 = vector.extract_strided_slice %27 {offsets = [0, 0, 48], sizes = [2, 8, 8], strides = [1, 1, 1]} : vector<2x8x96xf32> to vector<2x8x8xf32>
    %111 = vector.extract_strided_slice %27 {offsets = [0, 0, 80], sizes = [2, 8, 8], strides = [1, 1, 1]} : vector<2x8x96xf32> to vector<2x8x8xf32>
    "tpu.trace_start"() <{level = 10 : i32, message = "bqd,bkd->bqk"}> : () -> ()
    %cst_42 = arith.constant dense<0.000000e+00> : vector<2x8x8xf32>
    %112 = tpu.matmul %109, %110, %cst_42 {dimension_numbers = #tpu.dot_dimension_numbers<[2], [2], [1], [1], [0, 0, 0, 1, 1, 1], [0], [0]>} : vector<2x8x8xf32>, vector<2x8x8xf32>, vector<2x8x8xf32> -> vector<2x8x8xf32>
    "tpu.trace_stop"() : () -> ()
    %cst_43 = arith.constant 0.353553385 : f32
    %113 = vector.broadcast %cst_43 : f32 to vector<2x8x8xf32>
    %114 = arith.mulf %112, %113 : vector<2x8x8xf32>
    %115 = vector.broadcast %59 : vector<1x8x8xf32> to vector<2x8x8xf32>
    %116 = arith.mulf %114, %115 : vector<2x8x8xf32>
    %cst_44 = arith.constant dense<0xFF800000> : vector<2x8xf32>
    %117 = vector.multi_reduction <maximumf>, %116, %cst_44 [2] : vector<2x8x8xf32> to vector<2x8xf32>
    %118 = vector.shape_cast %117 : vector<2x8xf32> to vector<2x8x1xf32>
    %119 = vector.broadcast %118 : vector<2x8x1xf32> to vector<2x8x8xf32>
    %120 = arith.subf %116, %119 : vector<2x8x8xf32>
    %121 = math.exp %120 : vector<2x8x8xf32>
    %cst_45 = arith.constant dense<0.000000e+00> : vector<2x8xf32>
    %122 = vector.multi_reduction <add>, %121, %cst_45 [2] : vector<2x8x8xf32> to vector<2x8xf32>
    %123 = vector.shape_cast %122 : vector<2x8xf32> to vector<2x8x1xf32>
    %124 = tpu.reciprocal %123 : vector<2x8x1xf32> -> vector<2x8x1xf32>
    %125 = vector.broadcast %124 : vector<2x8x1xf32> to vector<2x8x8xf32>
    %126 = arith.mulf %121, %125 : vector<2x8x8xf32>
    %c0_46 = arith.constant 0 : index
    %c0_47 = arith.constant 0 : index
    %c16 = arith.constant 16 : index
    %127 = vector.load %arg14[%c0_46, %c0_47, %c16] : memref<2x8x32xf32, #tpu.memory_space<vmem>>, vector<2x8x8xf32>
    tpu.vector_store %arg14[%c0_46, %c0_47, %c16], %126 {strides = array<i32>} : memref<2x8x32xf32, #tpu.memory_space<vmem>>, vector<2x8x8xf32>,
    "tpu.trace_start"() <{level = 10 : i32, message = "bqk,bkd->bqd"}> : () -> ()
    %cst_48 = arith.constant dense<0.000000e+00> : vector<2x8x8xf32>
    %128 = tpu.matmul %126, %111, %cst_48 {dimension_numbers = #tpu.dot_dimension_numbers<[2], [1], [1], [2], [0, 0, 0, 1, 1, 2], [0], [0]>} : vector<2x8x8xf32>, vector<2x8x8xf32>, vector<2x8x8xf32> -> vector<2x8x8xf32>
    "tpu.trace_stop"() : () -> ()
    %129 = vector.shape_cast %128 : vector<2x8x8xf32> to vector<16x8xf32>
    %c16_49 = arith.constant 16 : index
    %c0_50 = arith.constant 0 : index
    %130 = vector.load %arg3[%c16_49, %c0_50] : memref<32x32xf32, #tpu.memory_space<vmem>>, vector<8x32xf32>
    %cst_51 = arith.constant dense<0.000000e+00> : vector<16x32xf32>
    %131 = tpu.matmul %129, %130, %cst_51 {dimension_numbers = #tpu.dot_dimension_numbers<[1], [0], [0], [1], [0, 0, 1, 1], [], []>} : vector<16x8xf32>, vector<8x32xf32>, vector<16x32xf32> -> vector<16x32xf32>
    %132 = arith.addf %108, %131 : vector<16x32xf32>
    %133 = vector.extract_strided_slice %27 {offsets = [0, 0, 24], sizes = [2, 8, 8], strides = [1, 1, 1]} : vector<2x8x96xf32> to vector<2x8x8xf32>
    %134 = vector.extract_strided_slice %27 {offsets = [0, 0, 56], sizes = [2, 8, 8], strides = [1, 1, 1]} : vector<2x8x96xf32> to vector<2x8x8xf32>
    %135 = vector.extract_strided_slice %27 {offsets = [0, 0, 88], sizes = [2, 8, 8], strides = [1, 1, 1]} : vector<2x8x96xf32> to vector<2x8x8xf32>
    "tpu.trace_start"() <{level = 10 : i32, message = "bqd,bkd->bqk"}> : () -> ()
    %cst_52 = arith.constant dense<0.000000e+00> : vector<2x8x8xf32>
    %136 = tpu.matmul %133, %134, %cst_52 {dimension_numbers = #tpu.dot_dimension_numbers<[2], [2], [1], [1], [0, 0, 0, 1, 1, 1], [0], [0]>} : vector<2x8x8xf32>, vector<2x8x8xf32>, vector<2x8x8xf32> -> vector<2x8x8xf32>
    "tpu.trace_stop"() : () -> ()
    %cst_53 = arith.constant 0.353553385 : f32
    %137 = vector.broadcast %cst_53 : f32 to vector<2x8x8xf32>
    %138 = arith.mulf %136, %137 : vector<2x8x8xf32>
    %139 = vector.broadcast %59 : vector<1x8x8xf32> to vector<2x8x8xf32>
    %140 = arith.mulf %138, %139 : vector<2x8x8xf32>
    %cst_54 = arith.constant dense<0xFF800000> : vector<2x8xf32>
    %141 = vector.multi_reduction <maximumf>, %140, %cst_54 [2] : vector<2x8x8xf32> to vector<2x8xf32>
    %142 = vector.shape_cast %141 : vector<2x8xf32> to vector<2x8x1xf32>
    %143 = vector.broadcast %142 : vector<2x8x1xf32> to vector<2x8x8xf32>
    %144 = arith.subf %140, %143 : vector<2x8x8xf32>
    %145 = math.exp %144 : vector<2x8x8xf32>
    %cst_55 = arith.constant dense<0.000000e+00> : vector<2x8xf32>
    %146 = vector.multi_reduction <add>, %145, %cst_55 [2] : vector<2x8x8xf32> to vector<2x8xf32>
    %147 = vector.shape_cast %146 : vector<2x8xf32> to vector<2x8x1xf32>
    %148 = tpu.reciprocal %147 : vector<2x8x1xf32> -> vector<2x8x1xf32>
    %149 = vector.broadcast %148 : vector<2x8x1xf32> to vector<2x8x8xf32>
    %150 = arith.mulf %145, %149 : vector<2x8x8xf32>
    %c0_56 = arith.constant 0 : index
    %c0_57 = arith.constant 0 : index
    %c24 = arith.constant 24 : index
    %151 = vector.load %arg14[%c0_56, %c0_57, %c24] : memref<2x8x32xf32, #tpu.memory_space<vmem>>, vector<2x8x8xf32>
    tpu.vector_store %arg14[%c0_56, %c0_57, %c24], %150 {strides = array<i32>} : memref<2x8x32xf32, #tpu.memory_space<vmem>>, vector<2x8x8xf32>,
    "tpu.trace_start"() <{level = 10 : i32, message = "bqk,bkd->bqd"}> : () -> ()
    %cst_58 = arith.constant dense<0.000000e+00> : vector<2x8x8xf32>
    %152 = tpu.matmul %150, %135, %cst_58 {dimension_numbers = #tpu.dot_dimension_numbers<[2], [1], [1], [2], [0, 0, 0, 1, 1, 2], [0], [0]>} : vector<2x8x8xf32>, vector<2x8x8xf32>, vector<2x8x8xf32> -> vector<2x8x8xf32>
    "tpu.trace_stop"() : () -> ()
    %153 = vector.shape_cast %152 : vector<2x8x8xf32> to vector<16x8xf32>
    %c24_59 = arith.constant 24 : index
    %c0_60 = arith.constant 0 : index
    %154 = vector.load %arg3[%c24_59, %c0_60] : memref<32x32xf32, #tpu.memory_space<vmem>>, vector<8x32xf32>
    %cst_61 = arith.constant dense<0.000000e+00> : vector<16x32xf32>
    %155 = tpu.matmul %153, %154, %cst_61 {dimension_numbers = #tpu.dot_dimension_numbers<[1], [0], [0], [1], [0, 0, 1, 1], [], []>} : vector<16x8xf32>, vector<8x32xf32>, vector<16x32xf32> -> vector<16x32xf32>
    %156 = arith.addf %132, %155 : vector<16x32xf32>
    %157 = arith.addf %0, %156 : vector<16x32xf32>
    %c0_62 = arith.constant 0 : index
    %c0_63 = arith.constant 0 : index
    %158 = vector.load %arg4[%c0_62, %c0_63] : memref<1x32xf32, #tpu.memory_space<vmem>>, vector<1x32xf32>
    %159 = vector.broadcast %158 : vector<1x32xf32> to vector<16x32xf32>
    %160 = arith.addf %157, %159 : vector<16x32xf32>
    %c0_64 = arith.constant 0 : index
    %c0_65 = arith.constant 0 : index
    %161 = vector.load %arg7[%c0_64, %c0_65] : memref<1x32xf32, #tpu.memory_space<vmem>>, vector<1x32xf32>
    %c0_66 = arith.constant 0 : index
    %c0_67 = arith.constant 0 : index
    %162 = vector.load %arg8[%c0_66, %c0_67] : memref<1x32xf32, #tpu.memory_space<vmem>>, vector<1x32xf32>
    %cst_68 = arith.constant dense<0.000000e+00> : vector<16xf32>
    %163 = vector.multi_reduction <add>, %160, %cst_68 [1] : vector<16x32xf32> to vector<16xf32>
    %164 = vector.shape_cast %163 : vector<16xf32> to vector<16x1xf32>
    %cst_69 = arith.constant 3.200000e+01 : f32
    %165 = vector.broadcast %cst_69 : f32 to vector<16x1xf32>
    %166 = arith.divf %164, %165 : vector<16x1xf32>
    %167 = vector.broadcast %166 : vector<16x1xf32> to vector<16x32xf32>
    %168 = arith.subf %160, %167 : vector<16x32xf32>
    %169 = arith.mulf %168, %168 : vector<16x32xf32>
    %cst_70 = arith.constant dense<0.000000e+00> : vector<16xf32>
    %170 = vector.multi_reduction <add>, %169, %cst_70 [1] : vector<16x32xf32> to vector<16xf32>
    %171 = vector.shape_cast %170 : vector<16xf32> to vector<16x1xf32>
    %cst_71 = arith.constant 3.200000e+01 : f32
    %172 = vector.broadcast %cst_71 : f32 to vector<16x1xf32>
    %173 = arith.divf %171, %172 : vector<16x1xf32>
    %174 = vector.broadcast %166 : vector<16x1xf32> to vector<16x32xf32>
    %175 = arith.subf %160, %174 : vector<16x32xf32>
    %cst_72 = arith.constant 9.99999974E-6 : f32
    %176 = vector.broadcast %cst_72 : f32 to vector<16x1xf32>
    %177 = arith.addf %173, %176 : vector<16x1xf32>
    %178 = math.rsqrt %177 : vector<16x1xf32>
    %179 = vector.broadcast %178 : vector<16x1xf32> to vector<16x32xf32>
    %180 = arith.mulf %175, %179 : vector<16x32xf32>
    %181 = vector.broadcast %161 : vector<1x32xf32> to vector<16x32xf32>
    %182 = arith.mulf %180, %181 : vector<16x32xf32>
    %183 = vector.broadcast %162 : vector<1x32xf32> to vector<16x32xf32>
    %184 = arith.addf %182, %183 : vector<16x32xf32>
    %c0_73 = arith.constant 0 : index
    %c0_74 = arith.constant 0 : index
    %185 = vector.load %arg9[%c0_73, %c0_74] : memref<32x128xf32, #tpu.memory_space<vmem>>, vector<32x128xf32>
    %cst_75 = arith.constant dense<0.000000e+00> : vector<16x128xf32>
    %186 = tpu.matmul %184, %185, %cst_75 {dimension_numbers = #tpu.dot_dimension_numbers<[1], [0], [0], [1], [0, 0, 1, 1], [], []>} : vector<16x32xf32>, vector<32x128xf32>, vector<16x128xf32> -> vector<16x128xf32>
    %c0_76 = arith.constant 0 : index
    %c0_77 = arith.constant 0 : index
    %187 = vector.load %arg10[%c0_76, %c0_77] : memref<1x128xf32, #tpu.memory_space<vmem>>, vector<1x128xf32>
    %188 = vector.broadcast %187 : vector<1x128xf32> to vector<16x128xf32>
    %189 = arith.addf %186, %188 : vector<16x128xf32>
    %cst_78 = arith.constant 5.000000e-01 : f32
    %190 = vector.broadcast %cst_78 : f32 to vector<16x128xf32>
    %191 = arith.mulf %190, %189 : vector<16x128xf32>
    %cst_79 = arith.constant 0.707106769 : f32
    %192 = vector.broadcast %cst_79 : f32 to vector<16x128xf32>
    %193 = arith.mulf %189, %192 : vector<16x128xf32>
    %194 = math.erf %193 : vector<16x128xf32>
    %cst_80 = arith.constant 1.000000e+00 : f32
    %195 = vector.broadcast %cst_80 : f32 to vector<16x128xf32>
    %196 = arith.addf %195, %194 : vector<16x128xf32>
    %197 = arith.mulf %191, %196 : vector<16x128xf32>
    %c0_81 = arith.constant 0 : index
    %c0_82 = arith.constant 0 : index
    %198 = vector.load %arg11[%c0_81, %c0_82] : memref<128x32xf32, #tpu.memory_space<vmem>>, vector<128x32xf32>
    %cst_83 = arith.constant dense<0.000000e+00> : vector<16x32xf32>
    %199 = tpu.matmul %197, %198, %cst_83 {dimension_numbers = #tpu.dot_dimension_numbers<[1], [0], [0], [1], [0, 0, 1, 1], [], []>} : vector<16x128xf32>, vector<128x32xf32>, vector<16x32xf32> -> vector<16x32xf32>
    %c0_84 = arith.constant 0 : index
    %c0_85 = arith.constant 0 : index
    %200 = vector.load %arg12[%c0_84, %c0_85] : memref<1x32xf32, #tpu.memory_space<vmem>>, vector<1x32xf32>
    %201 = vector.broadcast %200 : vector<1x32xf32> to vector<16x32xf32>
    %202 = arith.addf %199, %201 : vector<16x32xf32>
    %203 = arith.addf %160, %202 : vector<16x32xf32>
    %c0_86 = arith.constant 0 : index
    %c0_87 = arith.constant 0 : index
    %204 = vector.load %arg13[%c0_86, %c0_87] : memref<16x32xf32, #tpu.memory_space<vmem>>, vector<16x32xf32>
    tpu.vector_store %arg13[%c0_86, %c0_87], %203 {strides = array<i32>} : memref<16x32xf32, #tpu.memory_space<vmem>>, vector<16x32xf32>,
    return
  }
  func.func @transform_0(%arg0: i32) -> (i32, i32) {
    %c0_i32 = arith.constant 0 : i32
    %c0_i32_0 = arith.constant 0 : i32
    return %arg0, %c0_i32 : i32, i32
  }
  func.func @transform_1(%arg0: i32) -> (i32, i32) {
    %c0_i32 = arith.constant 0 : i32
    %c0_i32_0 = arith.constant 0 : i32
    %c0_i32_1 = arith.constant 0 : i32
    return %c0_i32, %c0_i32_0 : i32, i32
  }
  func.func @transform_2(%arg0: i32) -> (i32, i32) {
    %c0_i32 = arith.constant 0 : i32
    %c0_i32_0 = arith.constant 0 : i32
    %c0_i32_1 = arith.constant 0 : i32
    return %c0_i32, %c0_i32_0 : i32, i32
  }
  func.func @transform_3(%arg0: i32) -> (i32, i32) {
    %c0_i32 = arith.constant 0 : i32
    %c0_i32_0 = arith.constant 0 : i32
    %c0_i32_1 = arith.constant 0 : i32
    return %c0_i32, %c0_i32_0 : i32, i32
  }
  func.func @transform_4(%arg0: i32) -> (i32, i32) {
    %c0_i32 = arith.constant 0 : i32
    %c0_i32_0 = arith.constant 0 : i32
    %c0_i32_1 = arith.constant 0 : i32
    return %c0_i32, %c0_i32_0 : i32, i32
  }
  func.func @transform_5(%arg0: i32) -> (i32, i32) {
    %c0_i32 = arith.constant 0 : i32
    %c0_i32_0 = arith.constant 0 : i32
    %c0_i32_1 = arith.constant 0 : i32
    return %c0_i32, %c0_i32_0 : i32, i32
  }
  func.func @transform_6(%arg0: i32) -> (i32, i32) {
    %c0_i32 = arith.constant 0 : i32
    %c0_i32_0 = arith.constant 0 : i32
    %c0_i32_1 = arith.constant 0 : i32
    return %c0_i32, %c0_i32_0 : i32, i32
  }
  func.func @transform_7(%arg0: i32) -> (i32, i32) {
    %c0_i32 = arith.constant 0 : i32
    %c0_i32_0 = arith.constant 0 : i32
    %c0_i32_1 = arith.constant 0 : i32
    return %c0_i32, %c0_i32_0 : i32, i32
  }
  func.func @transform_8(%arg0: i32) -> (i32, i32) {
    %c0_i32 = arith.constant 0 : i32
    %c0_i32_0 = arith.constant 0 : i32
    %c0_i32_1 = arith.constant 0 : i32
    return %c0_i32, %c0_i32_0 : i32, i32
  }
  func.func @transform_9(%arg0: i32) -> (i32, i32) {
    %c0_i32 = arith.constant 0 : i32
    %c0_i32_0 = arith.constant 0 : i32
    %c0_i32_1 = arith.constant 0 : i32
    return %c0_i32, %c0_i32_0 : i32, i32
  }
  func.func @transform_10(%arg0: i32) -> (i32, i32) {
    %c0_i32 = arith.constant 0 : i32
    %c0_i32_0 = arith.constant 0 : i32
    %c0_i32_1 = arith.constant 0 : i32
    return %c0_i32, %c0_i32_0 : i32, i32
  }
  func.func @transform_11(%arg0: i32) -> (i32, i32) {
    %c0_i32 = arith.constant 0 : i32
    %c0_i32_0 = arith.constant 0 : i32
    %c0_i32_1 = arith.constant 0 : i32
    return %c0_i32, %c0_i32_0 : i32, i32
  }
  func.func @transform_12(%arg0: i32) -> (i32, i32) {
    %c0_i32 = arith.constant 0 : i32
    %c0_i32_0 = arith.constant 0 : i32
    return %arg0, %c0_i32 : i32, i32
  }
  func.func @transform_13(%arg0: i32) -> (i32, i32, i32) {
    %c0_i32 = arith.constant 0 : i32
    %c0_i32_0 = arith.constant 0 : i32
    %c0_i32_1 = arith.constant 0 : i32
    return %arg0, %c0_i32, %c0_i32_0 : i32, i32, i32
  }
}

</mosaic_0001>

<bundles_post_ra>
// kernel: tpu_custom_call.1
= control target key start
LH: loop header
LB: loop body
LE: loop exit
PB: predicated region body
PF: predicated region fallthrough
CT: control target
= control target key end

     0   :  { %19 = vsyncpa [#allocation3], 0  ;;  %vm49_vm0 = vcmask 261120   ;;  %s1790_s0 = inlined_call_operand.vmem [shape: f32[16,32], index: 0, kind: input, shape index: {}]   ;;  %s1791_s1 = inlined_call_operand.vmem [shape: f32[32,96], index: 1, kind: input, shape index: {}]   ;;  %s1792_s2 = inlined_call_operand.vmem [shape: f32[32,32], index: 2, kind: input, shape index: {}]   ;;  %s1793_s3 = inlined_call_operand.vmem [shape: f32[1,32], index: 3, kind: input, shape index: {}]   ;;  %s1794_s4 = inlined_call_operand.vmem [shape: f32[1,32], index: 4, kind: input, shape index: {}]   ;;  %s1795_s5 = inlined_call_operand.vmem [shape: f32[1,32], index: 5, kind: input, shape index: {}]   ;;  %s1796_s6 = inlined_call_operand.vmem [shape: f32[1,32], index: 6, kind: input, shape index: {}]   ;;  %s1797_s7 = inlined_call_operand.vmem [shape: f32[1,32], index: 7, kind: input, shape index: {}]   ;;  %s1798_s8 = inlined_call_operand.vmem [shape: f32[32,128], index: 8, kind: input, shape index: {}]   ;;  %s1799_s9 = inlined_call_operand.vmem [shape: f32[1,128], index: 9, kind: input, shape index: {}]   ;;  %s1800_s10 = inlined_call_operand.vmem [shape: f32[128,32], index: 10, kind: input, shape index: {}]   ;;  %s1801_s11 = inlined_call_operand.vmem [shape: f32[1,32], index: 11, kind: input, shape index: {}]   ;;  %s1802_s12 = inlined_call_operand.hbm [shape: f32[16,32], index: 12, kind: output, shape index: {0}]   ;;  %s1803_s13 = inlined_call_operand.hbm [shape: f32[2,8,32], index: 13, kind: output, shape index: {1}]  }
   0x1   :  { %v1481_v0 = vld [vmem:[%s1790_s0] sm:$0xff] }
   0x2   :  { %v50_v1 = vsel %vm49_vm0, %v1481_v0, 0.0 }
   0x3   :  { %51 = vadd.xlane.f32.xlu0 %v50_v1 }
   0x4   :  { %20 = vsyncpa [#allocation5], 0  ;;  %v1488_v2 = vld [vmem:[%s1790_s0 + $0x8] sm:$0xff]  ;;  %v1389_v4 = vmov 32.0   ;;  %v114_v21 = vld [vmem:[%s1791_s1 + $0x18] sm:$0xff]  ;;  %s1392_s22 = smov 120   ;;  %v144_v61 = vlaneseq }
   0x5   :  { %v53_v3 = vsel %vm49_vm0, %v1488_v2, 0.0  ;;  %1291 = vrcp.f32 %v1389_v4  ;;  %133 = vmatpush.msra.mxu0 %v114_v21  ;;  %v113_v22 = vld [vmem:[%s1791_s1 + $0x10] sm:$0xff]  ;;  %v112_v23 = vld [vmem:[%s1791_s1 + $0x8] sm:$0xff]  ;;  %v111_v24 = vld [vmem:[%s1791_s1] sm:$0xff]  ;;  %vm166_vm8 = vcmask 64512   ;;  %s1394_s23 = smov 64  }
   0x6   :  { %v1284_v39 = vld [vmem:[%s1794_s4] ss:$0 sm:$0xff]  ;;  %s1390_s4 = smov 88   ;;  %v147_v62 = vand.u32 127, %v144_v61  ;;  %v145_v63 = vshrl.u32 %v144_v61, 7  ;;  %s1395_s24 = smov 112  }
   0x7   :  { %134 = vmatpush.msra.mxu0 %v113_v22  ;;  %v1285_v43 = vld [vmem:[%s1795_s5] ss:$0 sm:$0xff]  ;;  %s1391_s5 = smov 96   ;;  %s1396_s25 = smov 56  }
   0x8   :  { %vm149_vm9 = vcmp.eq.s32.totalorder %v147_v62, 1  ;;  %vm150_vm10 = vcmp.eq.s32.totalorder %v147_v62, 2  ;;  %vm154_vm11 = vcmp.eq.s32.totalorder %v147_v62, 0  ;;  %vm148_vm12 = vcmp.eq.s32.totalorder %v145_v63, 0  ;;  %s1397_s26 = smov 80   ;;  %s1398_s27 = smov 72  }
   0x9   :  { %135 = vmatpush.msra.mxu0 %v112_v23  ;;  %vm151_vm13 = vmor %vm149_vm9, %vm150_vm10  ;;  %vm153_vm14 = vcmp.eq.s32.totalorder %v145_v63, 1  ;;  %s1399_s14 = smov 48   ;;  %s1400_s15 = smov 104  }
   0xa   :  { %vm155_vm15 = vmor %vm154_vm11, %vm150_vm10  ;;  %s1401_s18 = smov 40  }
   0xb   :  { %54 = vadd.xlane.f32.xlu0 %v53_v3  ;;  %v1292_v5 = vpop.eup %1291  ;;  %136 = vmatpush.msra.mxu0 %v111_v24  ;;  %v1393_v3 = vmov 1.0  }
   0xc   :  { %v57_v6 = vmul.f32 32.0, %v1292_v5  ;;  %vm61_vm1 = vweird.f32 %v1292_v5 }
   0xe   :  { %v58_v7 = vsub.f32 1.0, %v57_v6 }
  0x10   :  { %v59_v8 = vmul.f32 %v1292_v5, %v58_v7 }
  0x12   :  { %v60_v9 = vadd.f32 %v1292_v5, %v59_v8 }
  0x14   :  { %v1492_v10 = vsel %vm61_vm1, %v1292_v5, %v60_v9  ;;  %vm152_vm1 = vmand %vm148_vm12, %vm151_vm13 }
  0x76   :  { %v52_v11 = vpop.xlane.xlu0 %51 }
  0x77   :  { %v63_v12 = vmul.f32 %v1492_v10, %v52_v11 }
  0x79   :  { %v65_v13 = vsub.f32 %v1481_v0, %v63_v12 }
  0x7b   :  { %v67_v14 = vmul.f32 %v65_v13, %v65_v13 }
  0x7d   :  { %v69_v15 = vsel %vm49_vm0, %v67_v14, 0.0 }
  0x7e   :  { %70 = vadd.xlane.f32.xlu1 %v69_v15  ;;  %v55_v16 = vpop.xlane.xlu0 %54 }
  0x7f   :  { %v64_v17 = vmul.f32 %v1492_v10, %v55_v16 }
  0x81   :  { %v66_v18 = vsub.f32 %v1488_v2, %v64_v17 }
  0x83   :  { %v68_v19 = vmul.f32 %v66_v18, %v66_v18 }
  0x85   :  { %v72_v20 = vsel %vm49_vm0, %v68_v19, 0.0 }
  0x86   :  { %73 = vadd.xlane.f32.xlu1 %v72_v20 }
  0xf1   :  { %v71_v25 = vpop.xlane.xlu1 %70 }
  0xf2   :  { %v75_v26 = vmul.f32 %v71_v25, %v1492_v10 }
  0xf4   :  { %v77_v27 = vadd.f32 1e-05, %v75_v26 }
  0xf6   :  { %1293 = vrsqrt.f32 %v77_v27  ;;  %vm85_vm3 = vweird.f32 %v77_v27 }
  0xf9   :  { %v74_v28 = vpop.xlane.xlu1 %73 }
  0xfa   :  { %v76_v29 = vmul.f32 %v74_v28, %v1492_v10 }
  0xfc   :  { %v1294_v30 = vpop.eup %1293  ;;  %v78_v31 = vadd.f32 1e-05, %v76_v29 }
  0xfd   :  { %v80_v32 = vmul.f32 %v1294_v30, %v77_v27  ;;  %vm86_vm2 = vweird.f32 %v1294_v30 }
  0xfe   :  { %1295 = vrsqrt.f32 %v78_v31  ;;  %vm87_vm4 = vmor %vm85_vm3, %vm86_vm2  ;;  %vm95_vm6 = vweird.f32 %v78_v31  ;;  %vm158_vm3 = vcmp.eq.s32.totalorder %v145_v63, 2 }
  0xff   :  { %v81_v33 = vmul.f32 %v1294_v30, %v80_v32  ;;  %vm156_vm2 = vmand %vm153_vm14, %vm155_vm15 }
 0x101   :  { %v82_v34 = vmul.f32 0.5, %v81_v33 }
 0x103   :  { %v83_v35 = vsub.f32 1.5, %v82_v34 }
 0x104   :  { %v1296_v36 = vpop.eup %1295 }
 0x105   :  { %v84_v37 = vmul.f32 %v1294_v30, %v83_v35  ;;  %v90_v38 = vmul.f32 %v1296_v36, %v78_v31  ;;  %vm96_vm5 = vweird.f32 %v1296_v36 }
 0x106   :  { %vm97_vm7 = vmor %vm95_vm6, %vm96_vm5 }
 0x107   :  { %v88_v40 = vsel %vm87_vm4, %v1294_v30, %v84_v37  ;;  %v91_v41 = vmul.f32 %v1296_v36, %v90_v38  ;;  %vm159_vm4 = vmor %vm154_vm11, %vm149_vm9 }
 0x108   :  { %v99_v42 = vmul.f32 %v88_v40, %v65_v13  ;;  %vm157_vm5 = vmor %vm152_vm1, %vm156_vm2 }
 0x109   :  { %v92_v44 = vmul.f32 0.5, %v91_v41  ;;  %vm160_vm6 = vmand %vm158_vm3, %vm159_vm4 }
 0x10a   :  { %v104_v45 = vmul.f32 %v1284_v39, %v99_v42 }
 0x10b   :  { %v93_v46 = vsub.f32 1.5, %v92_v44 }
 0x10c   :  { %v109_v47 = vadd.f32 %v1285_v43, %v104_v45 }
 0x10d   :  { %v94_v48 = vmul.f32 %v1296_v36, %v93_v46 }
 0x10e   :  { %1227 = vmatmul.msk.f32.vlgmr.msra.gmra.mxu0 %vm49_vm0, %v109_v47 }
 0x10f   :  { %v98_v49 = vsel %vm97_vm7, %v1296_v36, %v94_v48  ;;  %vm161_vm7 = vmor %vm157_vm5, %vm160_vm6 }
 0x110   :  { %v100_v50 = vmul.f32 %v98_v49, %v66_v18  ;;  %v1542_v4 = vsel %vm161_vm7, 0.0, %v1393_v3 }
 0x112   :  { %v105_v51 = vmul.f32 %v1284_v39, %v100_v50 }
 0x114   :  { %v110_v52 = vadd.f32 %v1285_v43, %v105_v51 }
 0x116   :  { %1228 = vmatmul.msk.f32.gmra.mxu0 %vm49_vm0, %v110_v52 }
 0x18b   :  { %v1522_v53 = vpop.f32.mrf.mxu0 }
 0x18c   :  { %327 = vrot.lane.b32.xlu0 %v1522_v53, %s1390_s4  ;;  %164 = vrot.lane.b32.xlu2 %v1522_v53, %s1391_s5 }
 0x18d   :  { %325 = vrot.lane.b32.xlu1 %v1522_v53, %s1392_s22 }
 0x193   :  { %v1527_v54 = vpop.f32.mrf.mxu0 }
 0x194   :  { %192 = vrot.lane.b32.xlu2 %v1527_v54, %s1391_s5 }
 0x19c   :  { %355 = vrot.lane.b32.xlu2 %v1527_v54, %s1390_s4  ;;  %s1404_s4 = smov 16  }
 0x1a4   :  { %353 = vrot.lane.b32.xlu2 %v1527_v54, %s1392_s22  ;;  %s1407_s22 = smov [#allocation2]  }
 0x1e6   :  { %v165_v55 = vpop.permute.xlu2 %164 }
 0x1e7   :  { %1229 = vmatpush.xpose.msk.msra.mxu1 %vm166_vm8, %v165_v55 }
 0x1ea   :  { %1230 = vmatmul.msk.f32.vlgmr.msra.gmra.mxu1 %vm166_vm8, %v1522_v53 }
 0x1ee   :  { %v193_v56 = vpop.permute.xlu2 %192 }
 0x1ef   :  { %1231 = vmatpush.xpose.msk.msra.mxu2 %vm166_vm8, %v193_v56 }
 0x1f2   :  { %1232 = vmatmul.msk.f32.vlgmr.msra.gmra.mxu2 %vm166_vm8, %v1527_v54 }
 0x1f6   :  { %v356_v57 = vpop.permute.xlu2 %355 }
 0x1f7   :  { %1237 = vmatpush.xpose.msk.msrb.mxu2 %vm166_vm8, %v356_v57 }
 0x1fe   :  { %v354_v58 = vpop.permute.xlu2 %353  ;;  %v328_v59 = vpop.permute.xlu0 %327 }
 0x1ff   :  { %1235 = vmatpush.xpose.msk.msrb.mxu1 %vm166_vm8, %v328_v59  ;;  %1238 = vmatmul.msk.f32.vlgmr.msrb.gmra.mxu2 %vm166_vm8, %v354_v58  ;;  %v326_v60 = vpop.permute.xlu1 %325 }
 0x202   :  { %1236 = vmatmul.msk.f32.vlgmr.msrb.gmra.mxu1 %vm166_vm8, %v326_v60 }
 0x267   :  { %v188_v1 = vpop.f32.mrf.mxu1 }
 0x268   :  { %v218_v5 = vmul.f32 0.35355338, %v188_v1 }
 0x26a   :  { %v220_v6 = vmul.f32 %v218_v5, %v1542_v4 }
 0x26c   :  { %v222_v7 = vsel %vm166_vm8, %v220_v6, -inf }
 0x26d   :  { %223 = vmax.xlane.f32.xlu2 %v222_v7 }
 0x275   :  { %v215_v8 = vpop.f32.mrf.mxu2 }
 0x276   :  { %v219_v9 = vmul.f32 0.35355338, %v215_v8 }
 0x278   :  { %v221_v11 = vmul.f32 %v219_v9, %v1542_v4 }
 0x27a   :  { %v225_v12 = vsel %vm166_vm8, %v221_v11, -inf }
 0x27b   :  { %226 = vmax.xlane.f32.xlu0 %v225_v12 }
 0x27f   :  { %v350_v13 = vpop.f32.mrf.mxu1 }
 0x280   :  { %v381_v14 = vmul.f32 0.35355338, %v350_v13 }
 0x282   :  { %v383_v15 = vmul.f32 %v381_v14, %v1542_v4  ;;  %v378_v36 = vpop.f32.mrf.mxu2 }
 0x283   :  { %v382_v37 = vmul.f32 0.35355338, %v378_v36 }
 0x284   :  { %v385_v16 = vsel %vm166_vm8, %v383_v15, -inf }
 0x285   :  { %386 = vmax.xlane.f32.xlu1 %v385_v16  ;;  %v1570_v38 = vmul.f32 %v382_v37, %v1542_v4 }
 0x287   :  { %v388_v39 = vsel %vm166_vm8, %v1570_v38, -inf }
 0x28f   :  { %298 = vrot.lane.b32.xlu0 %v1527_v54, %s1394_s23 }
 0x29e   :  { %272 = vrot.lane.b32.xlu1 %v1522_v53, %s1394_s23  ;;  %s1195_s23 = sshll.u32 %s1407_s22, 4  ;;  %s1196_s23 = int_to_ptr.vmem [resolvable:$true] %s1195_s23 }
 0x2a6   :  { %553 = vrot.lane.b32.xlu1 %v1522_v53, %s1395_s24 }
 0x2ae   :  { %469 = vrot.lane.b32.xlu1 %v1527_v54, %s1396_s25 }
 0x2e0   :  { %v224_v17 = vpop.xlane.xlu2 %223 }
 0x2e1   :  { %v228_v18 = vsub.f32 %v220_v6, %v224_v17 }
 0x2e3   :  { %v230_v19 = vmul.f32 1.442695, %v228_v18 }
 0x2e5   :  { %1297 = vpow2.f32 %v230_v19 }
 0x2eb   :  { %v1298_v20 = vpop.eup %1297 }
 0x2ec   :  { %v234_v21 = vsel %vm166_vm8, %v1298_v20, 0.0 }
 0x2ed   :  { %235 = vadd.xlane.f32.xlu2 %v234_v21 }
 0x2ee   :  { %v227_v22 = vpop.xlane.xlu0 %226 }
 0x2ef   :  { %v229_v23 = vsub.f32 %v221_v11, %v227_v22 }
 0x2f1   :  { %v232_v24 = vmul.f32 1.442695, %v229_v23 }
 0x2f3   :  { %1299 = vpow2.f32 %v232_v24 }
 0x2f8   :  { %v387_v25 = vpop.xlane.xlu1 %386 }
 0x2f9   :  { %v1556_v26 = vpop.eup %1299  ;;  %v391_v27 = vsub.f32 %v383_v15, %v387_v25  ;;  %v494_v25 = vld [vmem:[%s1792_s2 + $0x8] sm:$0xff] }
 0x2fa   :  { %v237_v28 = vsel %vm166_vm8, %v1556_v26, 0.0  ;;  %516 = vmatpush.msrb.mxu0 %v494_v25 }
 0x2fb   :  { %v393_v29 = vmul.f32 1.442695, %v391_v27  ;;  %238 = vadd.xlane.f32.xlu0 %v237_v28 }
 0x2fd   :  { %1301 = vpow2.f32 %v393_v29 }
 0x301   :  { %v299_v33 = vpop.permute.xlu0 %298 }
 0x303   :  { %v1560_v30 = vpop.eup %1301 }
 0x304   :  { %v397_v31 = vsel %vm166_vm8, %v1560_v30, 0.0 }
 0x305   :  { %398 = vadd.xlane.f32.xlu2 %v397_v31 }
 0x30f   :  { %555 = vrot.lane.b32.xlu0 %v1522_v53, %s1397_s26 }
 0x310   :  { %v273_v32 = vpop.permute.xlu1 %272 }
 0x311   :  { %293 = vmatpush.msra.mxu3 %v273_v32 }
 0x313   :  { %319 = vmatpush.msrb.mxu3 %v299_v33  ;;  %v324_v33 = vld [vmem:[%s1792_s2] sm:$0xff] }
 0x314   :  { %545 = vmatpush.msra.mxu0 %v324_v33 }
 0x318   :  { %v1566_v34 = vpop.permute.xlu1 %553 }
 0x31d   :  { %444 = vrot.lane.b32.xlu2 %v1522_v53, %s1396_s25 }
 0x320   :  { %v470_v35 = vpop.permute.xlu1 %469 }
 0x321   :  { %489 = vmatpush.msra.mxu1 %v470_v35 }
 0x346   :  { %389 = vmax.xlane.f32.xlu2 %v388_v39 }
 0x35e   :  { %581 = vrot.lane.b32.xlu2 %v1527_v54, %s1395_s24 }
 0x360   :  { %v236_v40 = vpop.xlane.xlu2 %235 }
 0x361   :  { %1303 = vrcp.f32 %v236_v40  ;;  %v251_v44 = vand.u32 2147483648, %v236_v40  ;;  %v249_v46 = vand.u32 2147483647, %v236_v40  ;;  %vm245_vm10 = vweird.f32 %v236_v40 }
 0x363   :  { %v252_v49 = vor.u32 1.1754944e-38, %v251_v44  ;;  %vm250_vm12 = vcmp.eq.f32.partialorder %v249_v46, 8.507059e+37 }
 0x367   :  { %v1304_v41 = vpop.eup %1303 }
 0x368   :  { %v241_v42 = vmul.f32 %v1304_v41, %v236_v40  ;;  %vm246_vm9 = vweird.f32 %v1304_v41 }
 0x369   :  { %vm247_vm11 = vmor %vm245_vm10, %vm246_vm9 }
 0x36a   :  { %v242_v43 = vsub.f32 1.0, %v241_v42 }
 0x36c   :  { %v243_v45 = vmul.f32 %v1304_v41, %v242_v43 }
 0x36e   :  { %v239_v47 = vpop.xlane.xlu0 %238  ;;  %v244_v48 = vadd.f32 %v1304_v41, %v243_v45 }
 0x36f   :  { %1305 = vrcp.f32 %v239_v47  ;;  %v265_v59 = vand.u32 2147483648, %v239_v47  ;;  %v263_v61 = vand.u32 2147483647, %v239_v47  ;;  %vm259_vm14 = vweird.f32 %v239_v47 }
 0x370   :  { %v248_v50 = vsel %vm247_vm11, %v1304_v41, %v244_v48 }
 0x371   :  { %v253_v51 = vsel %vm250_vm12, %v252_v49, %v248_v50  ;;  %v266_v63 = vor.u32 1.1754944e-38, %v265_v59  ;;  %vm264_vm1 = vcmp.eq.f32.partialorder %v263_v61, 8.507059e+37 }
 0x372   :  { %v268_v52 = vmul.f32 %v1298_v20, %v253_v51 }
 0x374   :  { %1233 = vmatmul.msk.f32.vlgmr.msra.gmra.mxu3 %vm166_vm8, %v268_v52  ;;  %270 = vst.msk [vmem:[#allocation4] sm:$0xff] %vm166_vm8, %v268_v52 }
 0x375   :  { %v1306_v55 = vpop.eup %1305 }
 0x376   :  { %v255_v56 = vmul.f32 %v1306_v55, %v239_v47  ;;  %vm260_vm13 = vweird.f32 %v1306_v55 }
 0x377   :  { %vm261_vm15 = vmor %vm259_vm14, %vm260_vm13 }
 0x378   :  { %v256_v57 = vsub.f32 1.0, %v255_v56  ;;  %v399_v58 = vpop.xlane.xlu2 %398 }
 0x379   :  { %1307 = vrcp.f32 %v399_v58  ;;  %v414_v12 = vand.u32 2147483648, %v399_v58  ;;  %v412_v14 = vand.u32 2147483647, %v399_v58  ;;  %vm408_vm3 = vweird.f32 %v399_v58 }
 0x37a   :  { %v257_v60 = vmul.f32 %v1306_v55, %v256_v57 }
 0x37b   :  { %v415_v16 = vor.u32 1.1754944e-38, %v414_v12  ;;  %vm413_vm5 = vcmp.eq.f32.partialorder %v412_v14, 8.507059e+37 }
 0x37c   :  { %v258_v62 = vadd.f32 %v1306_v55, %v257_v60 }
 0x37e   :  { %v262_v1 = vsel %vm261_vm15, %v1306_v55, %v258_v62 }
 0x37f   :  { %v1308_v3 = vpop.eup %1307  ;;  %v267_v5 = vsel %vm264_vm1, %v266_v63, %v262_v1 }
 0x380   :  { %v404_v6 = vmul.f32 %v1308_v3, %v399_v58  ;;  %v445_v7 = vpop.permute.xlu2 %444  ;;  %v269_v8 = vmul.f32 %v1556_v26, %v267_v5  ;;  %vm409_vm2 = vweird.f32 %v1308_v3 }
 0x381   :  { %464 = vmatpush.msra.mxu3 %v445_v7  ;;  %v556_v9 = vpop.permute.xlu0 %555  ;;  %vm410_vm4 = vmor %vm408_vm3, %vm409_vm2 }
 0x382   :  { %v405_v11 = vsub.f32 1.0, %v404_v6  ;;  %1234 = vmatmul.msk.f32.vlgmr.msrb.gmra.mxu3 %vm166_vm8, %v269_v8  ;;  %271 = vst.msk [vmem:[#allocation4 + $0x8] sm:$0xff] %vm166_vm8, %v269_v8 }
 0x383   :  { %1245 = vmatpush.xpose.msk.msrb.mxu3 %vm166_vm8, %v556_v9 }
 0x384   :  { %v406_v13 = vmul.f32 %v1308_v3, %v405_v11 }
 0x386   :  { %v407_v15 = vadd.f32 %v1308_v3, %v406_v13 }
 0x388   :  { %v411_v17 = vsel %vm410_vm4, %v1308_v3, %v407_v15 }
 0x389   :  { %v416_v18 = vsel %vm413_vm5, %v415_v16, %v411_v17 }
 0x38a   :  { %v1583_v19 = vmul.f32 %v1560_v30, %v416_v18 }
 0x38c   :  { %1239 = vmatmul.msk.f32.vlgmr.msra.gmra.mxu3 %vm166_vm8, %v1583_v19 }
 0x394   :  { %1246 = vmatmul.msk.f32.vlgmr.msrb.gmra.mxu3 %vm166_vm8, %v1566_v34 }
 0x3b9   :  { %v390_v20 = vpop.xlane.xlu2 %389 }
 0x3ba   :  { %v392_v21 = vsub.f32 %v1570_v38, %v390_v20 }
 0x3bc   :  { %v395_v22 = vmul.f32 1.442695, %v392_v21 }
 0x3be   :  { %1309 = vpow2.f32 %v395_v22 }
 0x3c1   :  { %v582_v47 = vpop.permute.xlu2 %581 }
 0x3c4   :  { %v1310_v23 = vpop.eup %1309 }
 0x3c5   :  { %v400_v24 = vsel %vm166_vm8, %v1310_v23, 0.0 }
 0x3c6   :  { %401 = vadd.xlane.f32.xlu0 %v400_v24 }
 0x3da   :  { %583 = vrot.lane.b32.xlu0 %v1527_v54, %s1397_s26 }
 0x3e2   :  { %756 = vrot.lane.b32.xlu0 %v1522_v53, %s1398_s27 }
 0x3ea   :  { %784 = vrot.lane.b32.xlu0 %v1527_v54, %s1398_s27 }
 0x3f7   :  { %v295_v26 = vpop.f32.mrf.mxu3 }
 0x405   :  { %v321_v27 = vpop.f32.mrf.mxu3 }
 0x40f   :  { %v466_v28 = vpop.f32.mrf.mxu3 }
 0x410   :  { %1241 = vmatmul.msk.f32.vlgmr.msrb.gmra.mxu0 %vm166_vm8, %v466_v28 }
 0x417   :  { %v578_v29 = vpop.f32.mrf.mxu3 }
 0x418   :  { %v609_v30 = vmul.f32 0.35355338, %v578_v29  ;;  %v722_v29 = vld [vmem:[%s1792_s2 + $0x10] sm:$0xff] }
 0x419   :  { %744 = vmatpush.msra.mxu2 %v722_v29 }
 0x41a   :  { %v611_v31 = vmul.f32 %v609_v30, %v1542_v4 }
 0x41c   :  { %v613_v32 = vsel %vm166_vm8, %v611_v31, -inf }
 0x41d   :  { %614 = vmax.xlane.f32.xlu1 %v613_v32 }
 0x436   :  { %672 = vrot.lane.b32.xlu1 %v1522_v53, %s1399_s14 }
 0x439   :  { %v402_v34 = vpop.xlane.xlu0 %401 }
 0x43a   :  { %1311 = vrcp.f32 %v402_v34  ;;  %v428_v38 = vand.u32 2147483648, %v402_v34  ;;  %v426_v40 = vand.u32 2147483647, %v402_v34  ;;  %vm422_vm7 = vweird.f32 %v402_v34 }
 0x43c   :  { %v429_v42 = vor.u32 1.1754944e-38, %v428_v38  ;;  %vm427_vm10 = vcmp.eq.f32.partialorder %v426_v40, 8.507059e+37 }
 0x43e   :  { %782 = vrot.lane.b32.xlu1 %v1527_v54, %s1400_s15 }
 0x440   :  { %v1312_v35 = vpop.eup %1311 }
 0x441   :  { %v418_v36 = vmul.f32 %v1312_v35, %v402_v34  ;;  %vm423_vm6 = vweird.f32 %v1312_v35 }
 0x442   :  { %vm424_vm9 = vmor %vm422_vm7, %vm423_vm6 }
 0x443   :  { %v419_v37 = vsub.f32 1.0, %v418_v36 }
 0x445   :  { %v420_v39 = vmul.f32 %v1312_v35, %v419_v37 }
 0x447   :  { %v421_v41 = vadd.f32 %v1312_v35, %v420_v39 }
 0x449   :  { %v425_v43 = vsel %vm424_vm9, %v1312_v35, %v421_v41 }
 0x44a   :  { %v430_v44 = vsel %vm427_vm10, %v429_v42, %v425_v43 }
 0x44b   :  { %v1608_v45 = vmul.f32 %v1310_v23, %v430_v44 }
 0x44c   :  { %v584_v46 = vpop.permute.xlu0 %583 }
 0x44d   :  { %1240 = vmatmul.msk.f32.vlgmr.msra.gmra.mxu1 %vm166_vm8, %v1608_v45 }
 0x44e   :  { %1247 = vmatpush.xpose.msk.msrb.mxu1 %vm166_vm8, %v584_v46 }
 0x454   :  { %v757_v48 = vpop.permute.xlu0 %756 }
 0x455   :  { %1248 = vmatmul.msk.f32.vlgmr.msrb.gmra.mxu1 %vm166_vm8, %v582_v47  ;;  %1253 = vmatpush.xpose.msk.msrb.mxu0 %vm166_vm8, %v757_v48 }
 0x45c   :  { %v785_v57 = vpop.permute.xlu0 %784 }
 0x48d   :  { %v518_v17 = vpop.f32.mrf.mxu0 }
 0x490   :  { %v615_v49 = vpop.xlane.xlu1 %614 }
 0x491   :  { %v619_v50 = vsub.f32 %v611_v31, %v615_v49 }
 0x493   :  { %v621_v51 = vmul.f32 1.442695, %v619_v50 }
 0x495   :  { %1313 = vpow2.f32 %v621_v51 }
 0x49b   :  { %v1314_v52 = vpop.eup %1313 }
 0x49c   :  { %v625_v55 = vsel %vm166_vm8, %v1314_v52, 0.0 }
 0x49d   :  { %626 = vadd.xlane.f32.xlu2 %v625_v55 }
 0x4a8   :  { %v673_v56 = vpop.permute.xlu1 %672 }
 0x4a9   :  { %692 = vmatpush.msra.mxu3 %v673_v56 }
 0x4ab   :  { %1255 = vmatpush.xpose.msk.msrb.mxu3 %vm166_vm8, %v785_v57 }
 0x4b0   :  { %v783_v16 = vpop.permute.xlu1 %782 }
 0x4b5   :  { %754 = vrot.lane.b32.xlu2 %v1522_v53, %s1400_s15 }
 0x4ca   :  { %v491_v58 = vpop.f32.mrf.mxu1 }
 0x4cb   :  { %1242 = vmatmul.msk.f32.gmra.mxu0 %vm166_vm8, %v491_v58 }
 0x4d2   :  { %v606_v59 = vpop.f32.mrf.mxu1 }
 0x4d3   :  { %v610_v60 = vmul.f32 0.35355338, %v606_v59  ;;  %1243 = vmatmul.msk.f32.vlgmr.msra.gmra.mxu0 %vm166_vm8, %v295_v26 }
 0x4d5   :  { %v612_v61 = vmul.f32 %v610_v60, %v1542_v4 }
 0x4d7   :  { %v616_v62 = vsel %vm166_vm8, %v612_v61, -inf }
 0x4d8   :  { %617 = vmax.xlane.f32.xlu0 %v616_v62 }
 0x4db   :  { %1244 = vmatmul.msk.f32.gmra.mxu0 %vm166_vm8, %v321_v27 }
 0x510   :  { %v627_v63 = vpop.xlane.xlu2 %626 }
 0x511   :  { %1315 = vrcp.f32 %v627_v63  ;;  %v642_v7 = vand.u32 2147483648, %v627_v63  ;;  %v640_v9 = vand.u32 2147483647, %v627_v63  ;;  %vm636_vm12 = vweird.f32 %v627_v63 }
 0x513   :  { %v643_v12 = vor.u32 1.1754944e-38, %v642_v7  ;;  %vm641_vm14 = vcmp.eq.f32.partialorder %v640_v9, 8.507059e+37 }
 0x517   :  { %v1316_v1 = vpop.eup %1315 }
 0x518   :  { %v632_v3 = vmul.f32 %v1316_v1, %v627_v63  ;;  %v755_v5 = vpop.permute.xlu2 %754  ;;  %vm637_vm11 = vweird.f32 %v1316_v1 }
 0x519   :  { %1254 = vmatmul.msk.f32.vlgmr.msrb.gmra.mxu0 %vm166_vm8, %v755_v5  ;;  %vm638_vm13 = vmor %vm636_vm12, %vm637_vm11 }
 0x51a   :  { %v633_v6 = vsub.f32 1.0, %v632_v3 }
 0x51c   :  { %v634_v8 = vmul.f32 %v1316_v1, %v633_v6 }
 0x51e   :  { %v635_v11 = vadd.f32 %v1316_v1, %v634_v8 }
 0x520   :  { %v639_v13 = vsel %vm638_vm13, %v1316_v1, %v635_v11 }
 0x521   :  { %v644_v14 = vsel %vm641_vm14, %v643_v12, %v639_v13 }
 0x522   :  { %v1625_v15 = vmul.f32 %v1314_v52, %v644_v14 }
 0x524   :  { %1249 = vmatmul.msk.f32.vlgmr.msra.gmra.mxu3 %vm166_vm8, %v1625_v15 }
 0x52c   :  { %1256 = vmatmul.msk.f32.vlgmr.msrb.gmra.mxu3 %vm166_vm8, %v783_v16 }
 0x548   :  { %v521_v18 = vpop.f32.mrf.mxu0 }
 0x54b   :  { %v618_v20 = vpop.xlane.xlu0 %617 }
 0x54c   :  { %v620_v21 = vsub.f32 %v612_v61, %v618_v20 }
 0x54e   :  { %v623_v22 = vmul.f32 1.442695, %v620_v21 }
 0x550   :  { %1317 = vpow2.f32 %v623_v22  ;;  %v547_v23 = vpop.f32.mrf.mxu0 }
 0x551   :  { %v1630_v24 = vadd.f32 %v547_v23, %v518_v17 }
 0x556   :  { %v1318_v25 = vpop.eup %1317 }
 0x557   :  { %v628_v26 = vsel %vm166_vm8, %v1318_v25, 0.0 }
 0x558   :  { %v550_v27 = vpop.f32.mrf.mxu0  ;;  %629 = vadd.xlane.f32.xlu0 %v628_v26 }
 0x559   :  { %v1633_v28 = vadd.f32 %v550_v27, %v521_v18 }
 0x56c   :  { %697 = vrot.lane.b32.xlu0 %v1527_v54, %s1399_s14 }
 0x596   :  { %v779_v30 = vpop.f32.mrf.mxu0 }
 0x597   :  { %v810_v31 = vmul.f32 0.35355338, %v779_v30 }
 0x599   :  { %v812_v32 = vmul.f32 %v810_v31, %v1542_v4 }
 0x59b   :  { %v814_v33 = vsel %vm166_vm8, %v812_v32, -inf }
 0x59c   :  { %815 = vmax.xlane.f32.xlu2 %v814_v33  ;;  %v923_v33 = vld [vmem:[%s1792_s2 + $0x18] sm:$0xff]  ;;  %s1402_s2 = smov 8  }
 0x59d   :  { %945 = vmatpush.msra.mxu3 %v923_v33 }
 0x5a7   :  { %v694_v34 = vpop.f32.mrf.mxu3 }
 0x5a8   :  { %1251 = vmatmul.msk.f32.vlgmr.msra.gmra.mxu2 %vm166_vm8, %v694_v34 }
 0x5af   :  { %v807_v35 = vpop.f32.mrf.mxu3 }
 0x5b0   :  { %v811_v36 = vmul.f32 0.35355338, %v807_v35 }
 0x5b2   :  { %v813_v37 = vmul.f32 %v811_v36, %v1542_v4 }
 0x5b4   :  { %v817_v38 = vsel %vm166_vm8, %v813_v37, -inf }
 0x5b5   :  { %818 = vmax.xlane.f32.xlu1 %v817_v38 }
 0x5cb   :  { %v630_v39 = vpop.xlane.xlu0 %629 }
 0x5cc   :  { %1319 = vrcp.f32 %v630_v39  ;;  %v656_v43 = vand.u32 2147483648, %v630_v39  ;;  %v654_v46 = vand.u32 2147483647, %v630_v39  ;;  %vm650_vm1 = vweird.f32 %v630_v39 }
 0x5ce   :  { %v657_v48 = vor.u32 1.1754944e-38, %v656_v43  ;;  %vm655_vm3 = vcmp.eq.f32.partialorder %v654_v46, 8.507059e+37 }
 0x5d2   :  { %v1320_v40 = vpop.eup %1319 }
 0x5d3   :  { %v646_v41 = vmul.f32 %v1320_v40, %v630_v39  ;;  %vm651_vm15 = vweird.f32 %v1320_v40 }
 0x5d4   :  { %vm652_vm2 = vmor %vm650_vm1, %vm651_vm15  ;;  %vm669_vm1 = vcmask 195712  }
 0x5d5   :  { %v647_v42 = vsub.f32 1.0, %v646_v41 }
 0x5d7   :  { %v648_v44 = vmul.f32 %v1320_v40, %v647_v42 }
 0x5d9   :  { %v649_v47 = vadd.f32 %v1320_v40, %v648_v44 }
 0x5db   :  { %v653_v49 = vsel %vm652_vm2, %v1320_v40, %v649_v47  ;;  %v1286_v40 = vld [vmem:[%s1793_s3] ss:$0 sm:$0xff]  ;;  %s1403_s3 = smov 24   ;;  %vm870_vm2 = vcmask 261312  }
 0x5dc   :  { %v658_v50 = vsel %vm655_vm3, %v657_v48, %v653_v49 }
 0x5dd   :  { %v1645_v4 = vmul.f32 %v1318_v25, %v658_v50 }
 0x5de   :  { %v698_v51 = vpop.permute.xlu0 %697 }
 0x5df   :  { %717 = vmatpush.msra.mxu1 %v698_v51 }
 0x5e0   :  { %1250 = vmatmul.msk.f32.vlgmr.msra.gmra.mxu1 %vm166_vm8, %v1645_v4 }
 0x60f   :  { %v816_v52 = vpop.xlane.xlu2 %815 }
 0x610   :  { %v820_v55 = vsub.f32 %v812_v32, %v816_v52 }
 0x612   :  { %v822_v56 = vmul.f32 1.442695, %v820_v55 }
 0x614   :  { %1321 = vpow2.f32 %v822_v56 }
 0x61a   :  { %v1322_v57 = vpop.eup %1321 }
 0x61b   :  { %v826_v58 = vsel %vm166_vm8, %v1322_v57, 0.0 }
 0x61c   :  { %827 = vadd.xlane.f32.xlu2 %v826_v58 }
 0x628   :  { %v819_v59 = vpop.xlane.xlu1 %818 }
 0x629   :  { %v821_v60 = vsub.f32 %v813_v37, %v819_v59 }
 0x62b   :  { %v824_v61 = vmul.f32 1.442695, %v821_v60  ;;  %v746_v36 = vpop.f32.mrf.mxu2  ;;  %v1021_v60 = vld [vmem:[%s1798_s8 + $0x10] sm:$0xff] }
 0x62c   :  { %v752_v37 = vadd.f32 %v746_v36, %v1630_v24  ;;  %v1158_v36 = vld [vmem:[%s1800_s10 + $0x70] sm:$0xff] }
 0x62d   :  { %1323 = vpow2.f32 %v824_v61  ;;  %v1020_v61 = vld [vmem:[%s1798_s8 + $0x8] sm:$0xff] }
 0x633   :  { %v1324_v62 = vpop.eup %1323 }
 0x634   :  { %873 = vrot.lane.b32.xlu2 %v1522_v53, %s1401_s18  ;;  %v829_v63 = vsel %vm166_vm8, %v1324_v62, 0.0 }
 0x635   :  { %830 = vadd.xlane.f32.xlu1 %v829_v63 }
 0x64e   :  { %898 = vrot.lane.b32.xlu1 %v1527_v54, %s1401_s18 }
 0x65d   :  { %v719_v1 = vpop.f32.mrf.mxu1 }
 0x65e   :  { %1252 = vmatmul.msk.f32.gmra.mxu2 %vm166_vm8, %v719_v1 }
 0x68f   :  { %v828_v3 = vpop.xlane.xlu2 %827 }
 0x690   :  { %1325 = vrcp.f32 %v828_v3  ;;  %v843_v9 = vand.u32 2147483648, %v828_v3  ;;  %v841_v12 = vand.u32 2147483647, %v828_v3  ;;  %vm837_vm5 = vweird.f32 %v828_v3 }
 0x692   :  { %v844_v13 = vor.u32 1.1754944e-38, %v843_v9  ;;  %vm842_vm7 = vcmp.eq.f32.partialorder %v841_v12, 8.507059e+37  ;;  %v1287_v9 = vld [vmem:[%s1796_s6] ss:$0 sm:$0xff] }
 0x696   :  { %v1326_v5 = vpop.eup %1325 }
 0x697   :  { %v833_v6 = vmul.f32 %v1326_v5, %v828_v3  ;;  %v874_v7 = vpop.permute.xlu2 %873  ;;  %vm838_vm4 = vweird.f32 %v1326_v5 }
 0x698   :  { %893 = vmatpush.msrb.mxu1 %v874_v7  ;;  %vm839_vm6 = vmor %vm837_vm5, %vm838_vm4 }
 0x699   :  { %v834_v8 = vsub.f32 1.0, %v833_v6 }
 0x69b   :  { %v835_v11 = vmul.f32 %v1326_v5, %v834_v8 }
 0x69d   :  { %v836_v53 = vadd.f32 %v1326_v5, %v835_v11 }
 0x69f   :  { %v840_v14 = vsel %vm839_vm6, %v1326_v5, %v836_v53  ;;  %v1288_v53 = vld [vmem:[%s1797_s7] ss:$0 sm:$0xff] }
 0x6a0   :  { %v845_v54 = vsel %vm842_vm7, %v844_v13, %v840_v14 }
 0x6a1   :  { %v860_v16 = vmul.f32 %v1322_v57, %v845_v54 }
 0x6a3   :  { %1257 = vmatmul.msk.f32.vlgmr.msrb.gmra.mxu1 %vm166_vm8, %v860_v16 }
 0x6a8   :  { %v831_v17 = vpop.xlane.xlu1 %830 }
 0x6a9   :  { %1327 = vrcp.f32 %v831_v17  ;;  %v857_v25 = vand.u32 2147483648, %v831_v17  ;;  %vm851_vm10 = vweird.f32 %v831_v17  ;;  %v855_v26 = vand.u32 2147483647, %v831_v17 }
 0x6ab   :  { %v858_v29 = vor.u32 1.1754944e-38, %v857_v25  ;;  %vm856_vm12 = vcmp.eq.f32.partialorder %v855_v26, 8.507059e+37 }
 0x6af   :  { %v1328_v18 = vpop.eup %1327 }
 0x6b0   :  { %v847_v20 = vmul.f32 %v1328_v18, %v831_v17  ;;  %vm852_vm9 = vweird.f32 %v1328_v18 }
 0x6b1   :  { %vm853_vm11 = vmor %vm851_vm10, %vm852_vm9 }
 0x6b2   :  { %v848_v21 = vsub.f32 1.0, %v847_v20 }
 0x6b4   :  { %v849_v22 = vmul.f32 %v1328_v18, %v848_v21 }
 0x6b6   :  { %v850_v23 = vadd.f32 %v1328_v18, %v849_v22 }
 0x6b8   :  { %v854_v27 = vsel %vm853_vm11, %v1328_v18, %v850_v23 }
 0x6b9   :  { %v859_v30 = vsel %vm856_vm12, %v858_v29, %v854_v27 }
 0x6ba   :  { %v861_v32 = vmul.f32 %v1324_v62, %v859_v30 }
 0x6c0   :  { %v899_v31 = vpop.permute.xlu1 %898 }
 0x6c1   :  { %918 = vmatpush.msra.mxu0 %v899_v31 }
 0x6c2   :  { %1258 = vmatmul.msk.f32.vlgmr.msra.gmra.mxu0 %vm166_vm8, %v861_v32 }
 0x6e1   :  { %v749_v44 = vpop.f32.mrf.mxu2 }
 0x6e2   :  { %v753_v46 = vadd.f32 %v749_v44, %v1633_v28  ;;  %v1154_v44 = vld [vmem:[%s1800_s10 + $0x50] sm:$0xff] }
 0x720   :  { %v895_v34 = vpop.f32.mrf.mxu1 }
 0x721   :  { %1259 = vmatmul.msk.f32.vlgmr.msra.gmra.mxu3 %vm166_vm8, %v895_v34 }
 0x73f   :  { %v920_v35 = vpop.f32.mrf.mxu0 }
 0x740   :  { %1260 = vmatmul.msk.f32.gmra.mxu3 %vm166_vm8, %v920_v35  ;;  %vm441_vm8 = vcmask 130112   ;;  %v1159_v35 = vld [vmem:[%s1800_s10 + $0x78] sm:$0xff] }
 0x741   :  { %1164 = vmatpush.msrb.mxu2 %v1159_v35 }
 0x743   :  { %1165 = vmatpush.msrb.mxu2 %v1158_v36 }
 0x7a4   :  { %v947_v38 = vpop.f32.mrf.mxu3 }
 0x7a5   :  { %v953_v39 = vadd.f32 %v947_v38, %v752_v37  ;;  %v1157_v37 = vld [vmem:[%s1800_s10 + $0x68] sm:$0xff]  ;;  %v1289_v38 = vld [vmem:[%s1799_s9] ss:$0 sm:$0xff] }
 0x7a6   :  { %1166 = vmatpush.msrb.mxu2 %v1157_v37 }
 0x7a7   :  { %v955_v41 = vadd.f32 %v953_v39, %v1481_v0  ;;  %v1156_v39 = vld [vmem:[%s1800_s10 + $0x60] sm:$0xff] }
 0x7a8   :  { %1167 = vmatpush.msrb.mxu2 %v1156_v39 }
 0x7a9   :  { %v1666_v42 = vadd.f32 %v1286_v40, %v955_v41 }
 0x7ab   :  { %v965_v43 = vsel %vm49_vm0, %v1666_v42, 0.0 }
 0x7ac   :  { %966 = vadd.xlane.f32.xlu0 %v965_v43 }
 0x7c3   :  { %v950_v47 = vpop.f32.mrf.mxu3 }
 0x7c4   :  { %v954_v48 = vadd.f32 %v950_v47, %v753_v46  ;;  %v1153_v47 = vld [vmem:[%s1800_s10 + $0x48] sm:$0xff] }
 0x7c6   :  { %v956_v24 = vadd.f32 %v954_v48, %v1488_v2 }
 0x7c8   :  { %v1672_v49 = vadd.f32 %v1286_v40, %v956_v24  ;;  %v1155_v40 = vld [vmem:[%s1800_s10 + $0x58] sm:$0xff]  ;;  %v1152_v24 = vld [vmem:[%s1800_s10 + $0x40] sm:$0xff] }
 0x7c9   :  { %1168 = vmatpush.msrb.mxu2 %v1155_v40 }
 0x7ca   :  { %v968_v50 = vsel %vm49_vm0, %v1672_v49, 0.0 }
 0x7cb   :  { %969 = vadd.xlane.f32.xlu2 %v968_v50  ;;  %1169 = vmatpush.msrb.mxu2 %v1154_v44 }
 0x7cd   :  { %1170 = vmatpush.msrb.mxu2 %v1153_v47 }
 0x7cf   :  { %1171 = vmatpush.msrb.mxu2 %v1152_v24 }
 0x7e3   :  { %435 = vrot.lane.b32.xlu2 %v1583_v19, %s1402_s2 }
 0x7eb   :  { %864 = vrot.lane.b32.xlu2 %v860_v16, %s1403_s3 }
 0x81f   :  { %v967_v0 = vpop.xlane.xlu0 %966 }
 0x820   :  { %v971_v51 = vmul.f32 %v967_v0, %v1492_v10  ;;  %v1151_v0 = vld [vmem:[%s1800_s10 + $0x38] sm:$0xff] }
 0x821   :  { %1172 = vmatpush.msrb.mxu2 %v1151_v0 }
 0x822   :  { %v973_v28 = vsub.f32 %v1666_v42, %v971_v51 }
 0x824   :  { %v975_v52 = vmul.f32 %v973_v28, %v973_v28 }
 0x826   :  { %v977_v2 = vsel %vm49_vm0, %v975_v52, 0.0  ;;  %v1150_v52 = vld [vmem:[%s1800_s10 + $0x30] sm:$0xff] }
 0x827   :  { %978 = vadd.xlane.f32.xlu1 %v977_v2  ;;  %1173 = vmatpush.msrb.mxu2 %v1150_v52 }
 0x83e   :  { %v970_v55 = vpop.xlane.xlu2 %969 }
 0x83f   :  { %v972_v56 = vmul.f32 %v970_v55, %v1492_v10 }
 0x840   :  { %663 = vrot.lane.b32.xlu1 %v1625_v15, %s1404_s4  ;;  %v1022_v15 = vld [vmem:[%s1798_s8 + $0x18] sm:$0xff] }
 0x841   :  { %v974_v57 = vsub.f32 %v1672_v49, %v972_v56  ;;  %1045 = vmatpush.msra.mxu1 %v1022_v15  ;;  %v1149_v56 = vld [vmem:[%s1800_s10 + $0x28] sm:$0xff] }
 0x842   :  { %1174 = vmatpush.msrb.mxu2 %v1149_v56 }
 0x843   :  { %v976_v19 = vmul.f32 %v974_v57, %v974_v57  ;;  %1046 = vmatpush.msra.mxu1 %v1021_v60  ;;  %v1147_v60 = vld [vmem:[%s1800_s10 + $0x18] sm:$0xff] }
 0x845   :  { %v980_v58 = vsel %vm49_vm0, %v976_v19, 0.0  ;;  %1047 = vmatpush.msra.mxu1 %v1020_v61 }
 0x846   :  { %981 = vadd.xlane.f32.xlu0 %v980_v58  ;;  %v436_v59 = vpop.permute.xlu2 %435  ;;  %v1148_v58 = vld [vmem:[%s1800_s10 + $0x20] sm:$0xff] }
 0x847   :  { %442 = vst.msk [vmem:[#allocation4] sm:$0xff] %vm441_vm8, %v436_v59  ;;  %1175 = vmatpush.msrb.mxu2 %v1148_v58 }
 0x849   :  { %1176 = vmatpush.msrb.mxu2 %v1147_v60 }
 0x84e   :  { %v865_v14 = vpop.permute.xlu2 %864 }
 0x85a   :  { %437 = vrot.lane.b32.xlu0 %v1608_v45, %s1402_s2  ;;  %v1019_v45 = vld [vmem:[%s1798_s8] sm:$0xff] }
 0x85b   :  { %1048 = vmatpush.msra.mxu1 %v1019_v45  ;;  %v1146_v45 = vld [vmem:[%s1800_s10 + $0x10] sm:$0xff] }
 0x85c   :  { %1177 = vmatpush.msrb.mxu2 %v1146_v45 }
 0x862   :  { %665 = vrot.lane.b32.xlu0 %v1645_v4, %s1404_s4  ;;  %s1406_s4 = smov 128  }
 0x86a   :  { %866 = vrot.lane.b32.xlu0 %v861_v32, %s1403_s3  ;;  %s1210_s3 = sshll.u32 %s1803_s13, 4  ;;  %s1197_s13 = sshll.u32 %s1802_s12, 4  ;;  %s1211_s3 = int_to_ptr.hbm [resolvable:$true] %s1210_s3  ;;  %s1198_s13 = int_to_ptr.hbm [resolvable:$true] %s1197_s13 }
 0x89a   :  { %v979_v4 = vpop.xlane.xlu1 %978 }
 0x89b   :  { %v983_v62 = vmul.f32 %v979_v4, %v1492_v10 }
 0x89d   :  { %v985_v63 = vadd.f32 1e-05, %v983_v62 }
 0x89f   :  { %1329 = vrsqrt.f32 %v985_v63  ;;  %vm993_vm14 = vweird.f32 %v985_v63 }
 0x8a5   :  { %v1330_v1 = vpop.eup %1329 }
 0x8a6   :  { %v988_v3 = vmul.f32 %v1330_v1, %v985_v63  ;;  %vm994_vm13 = vweird.f32 %v1330_v1  ;;  %v1145_v63 = vld [vmem:[%s1800_s10 + $0x8] sm:$0xff] }
 0x8a7   :  { %vm995_vm15 = vmor %vm993_vm14, %vm994_vm13  ;;  %1178 = vmatpush.msrb.mxu2 %v1145_v63 }
 0x8a8   :  { %v989_v5 = vmul.f32 %v1330_v1, %v988_v3  ;;  %v1144_v3 = vld [vmem:[%s1800_s10] sm:$0xff]  ;;  %s1405_s10 = smov [#allocation4]  }
 0x8a9   :  { %1179 = vmatpush.msrb.mxu2 %v1144_v3  ;;  %s1208_s19 = sshll.u32 %s1405_s10, 4  ;;  %s1209_s19 = int_to_ptr.vmem [resolvable:$true] %s1208_s19 }
 0x8aa   :  { %v990_v6 = vmul.f32 0.5, %v989_v5 }
 0x8ac   :  { %v991_v7 = vsub.f32 1.5, %v990_v6 }
 0x8ae   :  { %v992_v8 = vmul.f32 %v1330_v1, %v991_v7 }
 0x8b0   :  { %v996_v11 = vsel %vm995_vm15, %v1330_v1, %v992_v8 }
 0x8b1   :  { %v1007_v12 = vmul.f32 %v996_v11, %v973_v28 }
 0x8b2   :  { %v664_v13 = vpop.permute.xlu1 %663 }
 0x8b3   :  { %v1012_v54 = vmul.f32 %v1287_v9, %v1007_v12  ;;  %670 = vst.msk [vmem:[#allocation4] sm:$0xff] %vm669_vm1, %v664_v13 }
 0x8b4   :  { %871 = vst.msk [vmem:[#allocation4] sm:$0xff] %vm870_vm2, %v865_v14 }
 0x8b5   :  { %v1017_v16 = vadd.f32 %v1288_v53, %v1012_v54 }
 0x8b7   :  { %1261 = vmatmul.msk.f32.vlgmr.msra.gmra.mxu1 %vm49_vm0, %v1017_v16 }
 0x8b9   :  { %v982_v17 = vpop.xlane.xlu0 %981 }
 0x8ba   :  { %v984_v18 = vmul.f32 %v982_v17, %v1492_v10 }
 0x8bc   :  { %v986_v20 = vadd.f32 1e-05, %v984_v18 }
 0x8be   :  { %1331 = vrsqrt.f32 %v986_v20  ;;  %vm1003_vm4 = vweird.f32 %v986_v20 }
 0x8c4   :  { %v1332_v21 = vpop.eup %1331 }
 0x8c5   :  { %v998_v22 = vmul.f32 %v1332_v21, %v986_v20  ;;  %vm1004_vm3 = vweird.f32 %v1332_v21 }
 0x8c6   :  { %vm1005_vm5 = vmor %vm1003_vm4, %vm1004_vm3 }
 0x8c7   :  { %v999_v23 = vmul.f32 %v1332_v21, %v998_v22 }
 0x8c9   :  { %v1000_v25 = vmul.f32 0.5, %v999_v23 }
 0x8cb   :  { %v1001_v26 = vsub.f32 1.5, %v1000_v25 }
 0x8cc   :  { %v438_v27 = vpop.permute.xlu0 %437 }
 0x8cd   :  { %v1002_v29 = vmul.f32 %v1332_v21, %v1001_v26  ;;  %443 = vst.msk [vmem:[#allocation4 + $0x8] sm:$0xff] %vm441_vm8, %v438_v27 }
 0x8cf   :  { %v1006_v30 = vsel %vm1005_vm5, %v1332_v21, %v1002_v29 }
 0x8d0   :  { %v1008_v31 = vmul.f32 %v1006_v30, %v974_v57 }
 0x8d2   :  { %v1013_v32 = vmul.f32 %v1287_v9, %v1008_v31 }
 0x8d4   :  { %v666_v33 = vpop.permute.xlu0 %665  ;;  %v1018_v34 = vadd.f32 %v1288_v53, %v1013_v32 }
 0x8d5   :  { %671 = vst.msk [vmem:[#allocation4 + $0x8] sm:$0xff] %vm669_vm1, %v666_v33 }
 0x8d6   :  { %1262 = vmatmul.msk.f32.gmra.mxu1 %vm49_vm0, %v1018_v34 }
 0x8dc   :  { %v867_v10 = vpop.permute.xlu0 %866 }
 0x8dd   :  { %872 = vst.msk [vmem:[#allocation4 + $0x8] sm:$0xff] %vm870_vm2, %v867_v10 }
 0x8de   :  { %1216 = dma.vmem_to_hbm [thread:$0]  %s1209_s19, 256, %s1211_s3, [#allocation5], %s1406_s4, %s1406_s4, %s1402_s2  }
 0x934   :  { %v1050_v41 = vpop.f32.mrf.mxu1 }
 0x935   :  { %v1734_v43 = vadd.f32 %v1289_v38, %v1050_v41 }
 0x937   :  { %v1058_v46 = vmul.f32 0.70710677, %v1734_v43  ;;  %v1056_v44 = vmul.f32 0.5, %v1734_v43 }
 0x939   :  { %v1060_v48 = vmul.f32 %v1058_v46, %v1058_v46 }
 0x93b   :  { %v1061_v50 = vmin.f32 %v1060_v48, 16.0 }
 0x93d   :  { %v1062_v51 = vmul.f32 2.1237322e-06, %v1061_v50  ;;  %v1073_v28 = vmul.f32 3.8918573e-05, %v1061_v50 }
 0x93f   :  { %v1063_v2 = vadd.f32 0.00028619796, %v1062_v51  ;;  %v1074_v55 = vadd.f32 0.001143296, %v1073_v28 }
 0x941   :  { %v1064_v57 = vmul.f32 %v1063_v2, %v1061_v50  ;;  %v1075_v19 = vmul.f32 %v1074_v55, %v1061_v50 }
 0x943   :  { %v1065_v59 = vadd.f32 0.0036580483, %v1064_v57  ;;  %v1076_v15 = vadd.f32 0.014752088, %v1075_v19 }
 0x945   :  { %v1077_v61 = vmul.f32 %v1076_v15, %v1061_v50  ;;  %v1066_v4 = vmul.f32 %v1065_v59, %v1061_v50 }
 0x947   :  { %v1078_v62 = vadd.f32 0.112945676, %v1077_v61  ;;  %v1067_v5 = vadd.f32 0.05243302, %v1066_v4 }
 0x949   :  { %v1079_v1 = vmul.f32 %v1078_v62, %v1061_v50  ;;  %v1068_v8 = vmul.f32 %v1067_v5, %v1061_v50 }
 0x94b   :  { %v1080_v6 = vadd.f32 0.4994258, %v1079_v1  ;;  %v1069_v11 = vadd.f32 0.18741608, %v1068_v8  ;;  %v1290_v8 = vld [vmem:[%s1801_s11] ss:$0 sm:$0xff] }
 0x94d   :  { %v1081_v7 = vmul.f32 %v1080_v6, %v1061_v50  ;;  %v1070_v54 = vmul.f32 %v1069_v11, %v1061_v50 }
 0x94f   :  { %v1082_v9 = vadd.f32 1.0, %v1081_v7  ;;  %v1071_v21 = vadd.f32 1.1283791, %v1070_v54 }
 0x951   :  { %1333 = vrcp.f32 %v1082_v9  ;;  %v1092_v22 = vand.u32 2147483647, %v1082_v9  ;;  %v1094_v23 = vand.u32 2147483648, %v1082_v9  ;;  %vm1088_vm7 = vweird.f32 %v1082_v9 }
 0x952   :  { %v1072_v32 = vmul.f32 %v1071_v21, %v1058_v46 }
 0x953   :  { %v1053_v12 = vpop.f32.mrf.mxu1  ;;  %v1095_v33 = vor.u32 1.1754944e-38, %v1094_v23  ;;  %vm1093_vm10 = vcmp.eq.f32.partialorder %v1092_v22, 8.507059e+37 }
 0x954   :  { %v1770_v53 = vadd.f32 %v1289_v38, %v1053_v12 }
 0x956   :  { %v1059_v13 = vmul.f32 0.70710677, %v1770_v53  ;;  %v1057_v5 = vmul.f32 0.5, %v1770_v53 }
 0x957   :  { %v1334_v14 = vpop.eup %1333 }
 0x958   :  { %v1084_v16 = vmul.f32 %v1334_v14, %v1082_v9  ;;  %v1100_v17 = vmul.f32 %v1059_v13, %v1059_v13  ;;  %vm1089_vm6 = vweird.f32 %v1334_v14 }
 0x959   :  { %vm1090_vm9 = vmor %vm1088_vm7, %vm1089_vm6 }
 0x95a   :  { %v1085_v18 = vsub.f32 1.0, %v1084_v16  ;;  %v1101_v20 = vmin.f32 %v1100_v17, 16.0 }
 0x95c   :  { %v1086_v25 = vmul.f32 %v1334_v14, %v1085_v18  ;;  %v1102_v26 = vmul.f32 2.1237322e-06, %v1101_v20  ;;  %v1113_v27 = vmul.f32 3.8918573e-05, %v1101_v20 }
 0x95e   :  { %v1087_v29 = vadd.f32 %v1334_v14, %v1086_v25  ;;  %v1103_v30 = vadd.f32 0.00028619796, %v1102_v26  ;;  %v1114_v31 = vadd.f32 0.001143296, %v1113_v27 }
 0x960   :  { %v1091_v34 = vsel %vm1090_vm9, %v1334_v14, %v1087_v29  ;;  %v1104_v10 = vmul.f32 %v1103_v30, %v1101_v20  ;;  %v1115_v35 = vmul.f32 %v1114_v31, %v1101_v20 }
 0x961   :  { %v1096_v36 = vsel %vm1093_vm10, %v1095_v33, %v1091_v34 }
 0x962   :  { %v1097_v37 = vmul.f32 %v1096_v36, %v1072_v32  ;;  %v1116_v38 = vadd.f32 0.014752088, %v1115_v35  ;;  %v1105_v39 = vadd.f32 0.0036580483, %v1104_v10 }
 0x964   :  { %v1263_v40 = vclamps-f32 %v1097_v37, 1.0  ;;  %v1117_v41 = vmul.f32 %v1116_v38, %v1101_v20  ;;  %v1106_v24 = vmul.f32 %v1105_v39, %v1101_v20 }
 0x966   :  { %v1140_v47 = vadd.f32 1.0, %v1263_v40  ;;  %v1118_v48 = vadd.f32 0.112945676, %v1117_v41  ;;  %v1107_v51 = vadd.f32 0.05243302, %v1106_v24 }
 0x968   :  { %v1142_v50 = vmul.f32 %v1140_v47, %v1056_v44  ;;  %v1119_v0 = vmul.f32 %v1118_v48, %v1101_v20  ;;  %v1108_v2 = vmul.f32 %v1107_v51, %v1101_v20 }
 0x96a   :  { %1180 = vmatmul.f32.vlgmr.msrb.gmra.mxu2 %v1142_v50  ;;  %v1120_v46 = vadd.f32 0.4994258, %v1119_v0  ;;  %v1109_v55 = vadd.f32 0.18741608, %v1108_v2 }
 0x96c   :  { %v1121_v28 = vmul.f32 %v1120_v46, %v1101_v20  ;;  %v1110_v57 = vmul.f32 %v1109_v55, %v1101_v20 }
 0x96e   :  { %v1122_v52 = vadd.f32 1.0, %v1121_v28  ;;  %v1111_v15 = vadd.f32 1.1283791, %v1110_v57 }
 0x970   :  { %1335 = vrcp.f32 %v1122_v52  ;;  %v1134_v59 = vand.u32 2147483648, %v1122_v52  ;;  %v1132_v60 = vand.u32 2147483647, %v1122_v52  ;;  %vm1128_vm12 = vweird.f32 %v1122_v52 }
 0x971   :  { %v1112_v4 = vmul.f32 %v1111_v15, %v1059_v13 }
 0x972   :  { %v1135_v45 = vor.u32 1.1754944e-38, %v1134_v59  ;;  %vm1133_vm13 = vcmp.eq.f32.partialorder %v1132_v60, 8.507059e+37 }
 0x976   :  { %v1336_v56 = vpop.eup %1335 }
 0x977   :  { %v1124_v19 = vmul.f32 %v1336_v56, %v1122_v52  ;;  %vm1129_vm11 = vweird.f32 %v1336_v56 }
 0x978   :  { %vm1130_vm8 = vmor %vm1128_vm12, %vm1129_vm11 }
 0x979   :  { %v1125_v58 = vsub.f32 1.0, %v1124_v19 }
 0x97b   :  { %v1126_v43 = vmul.f32 %v1336_v56, %v1125_v58 }
 0x97d   :  { %v1127_v61 = vadd.f32 %v1336_v56, %v1126_v43 }
 0x97f   :  { %v1131_v62 = vsel %vm1130_vm8, %v1336_v56, %v1127_v61 }
 0x980   :  { %v1136_v63 = vsel %vm1133_vm13, %v1135_v45, %v1131_v62 }
 0x981   :  { %v1137_v1 = vmul.f32 %v1136_v63, %v1112_v4 }
 0x983   :  { %v1264_v3 = vclamps-f32 %v1137_v1, 1.0 }
 0x985   :  { %v1141_v6 = vadd.f32 1.0, %v1264_v3 }
 0x987   :  { %v1143_v7 = vmul.f32 %v1141_v6, %v1057_v5 }
 0x989   :  { %1183 = vmatmul.f32.gmra.mxu2 %v1143_v7 }
 0x9ed   :  { %v1181_v9 = vpop.f32.mrf.mxu2 }
 0x9ee   :  { %v1182_v11 = vadd.f32 %v1290_v8, %v1181_v9 }
 0x9f0   :  { %v1187_v12 = vadd.f32 %v1182_v11, %v1666_v42 }
 0x9f2   :  { %1189 = vst.msk [vmem:[#allocation2] sm:$0xff] %vm49_vm0, %v1187_v12 }
 0xa0c   :  { %v1184_v53 = vpop.f32.mrf.mxu2 }
 0xa0d   :  { %v1185_v13 = vadd.f32 %v1290_v8, %v1184_v53 }
 0xa0f   :  { %v1188_v14 = vadd.f32 %v1185_v13, %v1672_v49 }
 0xa11   :  { %1190 = vst.msk [vmem:[#allocation2 + $0x8] sm:$0xff] %vm49_vm0, %v1188_v14 }
 0xa12   :  { %1203 = dma.vmem_to_hbm [thread:$0]  %s1196_s23, 256, %s1198_s13, [#allocation3], %s1406_s4, %s1406_s4, %s1402_s2  }
 0xa13   :  { %1385 = dma.done.wait [#allocation3], 256  }
 0xa14   :  { %1386 = vsyncadd [#allocation3], 4294967040 }
 0xa15   :  { %1387 = dma.done.wait [#allocation5], 256  }
 0xa16   :  { %1388 = vsyncadd [#allocation5], 4294967040 }
 0xa17   :  { %1225 = vsyncpa [#allocation3], 1 }
 0xa18   :  { %1226 = vsyncpa [#allocation5], 1 }

</bundles_post_ra>
